<compile_context>
chip_gen: v5e
topology: v5e:2x2
jax: 0.10.0
libtpu: 0.0.40
codegen_flags: <defaults>
</compile_context>

<pallas_src>
import jax
import jax.numpy as jnp
from jax.experimental import pallas as pl
from jax.experimental.pallas import tpu as pltpu

# ----------------------------- configuration --------------------------------
USER_NUM = 50
ITEM_NUM = 40
FACTOR_NUM = 16          # predictive factors
NUM_LAYERS = 3           # MLP depth
MODEL = "NeuMF-end"      # exercise both GMF and MLP paths
BATCH = 256              # multiple of TILE_B
TILE_B = 128             # batch rows per grid step (MXU M dimension)


def _round_up(x, m):
    return (x + m - 1) // m * m


# ------------------------------- kernel -------------------------------------
def make_ncf_kernel(num_layers):
    """Kernel closure over the (static) number of MLP layers.

    Ref order:
      user_idx, item_idx,                        # (TB,1) int32 batch tiles
      gmf_user_tbl, gmf_item_tbl,                # (U_PAD,F), (I_PAD,F)
      mlp_user_l0, mlp_item_l0,                  # pre-fused table@W0 halves
      b0,                                        # (1, F*2^(L-1))
      (W_l, b_l) for l = 1 .. num_layers-1,
      wp_gmf, wp_mlp, bp,                        # predict split (no concat)
      out_ref                                    # (TB,1) f32
    """

    def kernel(*refs):
        (u_ref, i_ref, gu_ref, gi_ref, au_ref, ai_ref, b0_ref) = refs[:7]
        wpg_ref, wpm_ref, bp_ref = refs[-4], refs[-3], refs[-2]
        out_ref = refs[-1]

        tb = u_ref.shape[0]
        u_pad = gu_ref.shape[0]
        i_pad = gi_ref.shape[0]

        # In-kernel embedding gather via one-hot matmul (exact row selection,
        # MXU-friendly; tables are tiny so O(B * table_rows) one-hots are cheap).
        u_oh = (u_ref[...] ==
                jax.lax.broadcasted_iota(jnp.int32, (tb, u_pad), 1)
                ).astype(jnp.float32)
        i_oh = (i_ref[...] ==
                jax.lax.broadcasted_iota(jnp.int32, (tb, i_pad), 1)
                ).astype(jnp.float32)

        # GMF branch: gather both embeddings, elementwise product (VPU).
        gmf_u = jnp.dot(u_oh, gu_ref[...], preferred_element_type=jnp.float32)
        gmf_i = jnp.dot(i_oh, gi_ref[...], preferred_element_type=jnp.float32)
        gmf = gmf_u * gmf_i

        # MLP layer 0: gather + Linear fused into a single matmul per side
        # (tables were pre-multiplied by the split layer-0 weight host-side).
        h = (jnp.dot(u_oh, au_ref[...], preferred_element_type=jnp.float32)
             + jnp.dot(i_oh, ai_ref[...], preferred_element_type=jnp.float32)
             + b0_ref[...])
        h = jnp.maximum(h, 0.0)

        # Remaining MLP layers (Dropout = identity -> Linear -> ReLU).
        idx = 7
        for _ in range(num_layers - 1):
            w_ref, b_ref = refs[idx], refs[idx + 1]
            idx += 2
            h = jnp.dot(h, w_ref[...], preferred_element_type=jnp.float32)
            h = jnp.maximum(h + b_ref[...], 0.0)

        # Predict layer with split weights == Linear(concat([gmf, h])).
        # N=1 matmul replaced by VPU multiply + cross-lane (XLU) reduction.
        pred = (jnp.sum(gmf * wpg_ref[...], axis=-1, keepdims=True)
                + jnp.sum(h * wpm_ref[...], axis=-1, keepdims=True)
                + bp_ref[...])
        out_ref[...] = pred

    return kernel


# ------------------------- kernel-ready param repack --------------------------
def prepare_kernel_params(params):
    """One-time repack: row-pad embedding tables (one-hot K dim), fuse the MLP
    tables with the split layer-0 weight, split the predict weight so no
    concatenation is needed anywhere."""
    f = FACTOR_NUM
    e = params["embed_user_MLP"].shape[1]
    u_pad = _round_up(params["embed_user_GMF"].shape[0], 128)
    i_pad = _round_up(params["embed_item_GMF"].shape[0], 128)

    def pad_rows(t, n):
        return jnp.pad(t, ((0, n - t.shape[0]), (0, 0)))

    w0, b0 = params["mlp"][0]
    wp = params["w_predict"]
    mlp_user = pad_rows(params["embed_user_MLP"], u_pad)
    mlp_item = pad_rows(params["embed_item_MLP"], i_pad)
    return {
        "gmf_user": pad_rows(params["embed_user_GMF"], u_pad),
        "gmf_item": pad_rows(params["embed_item_GMF"], i_pad),
        # table @ W0-half fused host-side (exact: one-hot gather is exact).
        "mlp_user_l0": mlp_user @ w0[:e],     # (u_pad, e)
        "mlp_item_l0": mlp_item @ w0[e:],     # (i_pad, e)
        "b0": b0,
        "mlp_rest": list(params["mlp"][1:]),
        "wp_gmf": wp[:f, 0].reshape(1, f),
        "wp_mlp": wp[f:, 0].reshape(1, f),
        "bp": params["b_predict"].reshape(1, 1),
    }


# ------------------------------ wrapper --------------------------------------
@jax.jit
def ncf_forward(user, item, kp):
    """Forward pass matching NCF.forward for model='NeuMF-end' (eval mode)."""
    b = user.shape[0]
    b_pad = _round_up(b, TILE_B)
    # Pad the batch with index 0 (valid row); padded rows are sliced off below.
    u = jnp.pad(user.astype(jnp.int32), (0, b_pad - b)).reshape(b_pad, 1)
    v = jnp.pad(item.astype(jnp.int32), (0, b_pad - b)).reshape(b_pad, 1)

    inputs = [u, v,
              kp["gmf_user"], kp["gmf_item"],
              kp["mlp_user_l0"], kp["mlp_item_l0"], kp["b0"]]
    for w, bl in kp["mlp_rest"]:
        inputs += [w, bl]
    inputs += [kp["wp_gmf"], kp["wp_mlp"], kp["bp"]]

    batch_spec = pl.BlockSpec((TILE_B, 1), lambda i: (i, 0))
    # Constant block index -> weights/tables stay VMEM-resident across steps.
    resident = lambda x: pl.BlockSpec(x.shape, lambda i: (0, 0))
    in_specs = [batch_spec, batch_spec] + [resident(x) for x in inputs[2:]]

    out = pl.pallas_call(
        make_ncf_kernel(len(kp["mlp_rest"]) + 1),
        out_shape=jax.ShapeDtypeStruct((b_pad, 1), jnp.float32),
        grid=(b_pad // TILE_B,),
        in_specs=in_specs,
        out_specs=pl.BlockSpec((TILE_B, 1), lambda i: (i, 0)),
        compiler_params=pltpu.CompilerParams(
            dimension_semantics=("parallel",)),
    )(*inputs)

    # prediction.view(-1)
    return out[:b, 0]


# --------------------------- parameter init ----------------------------------
def init_params(key):
    """Deterministic init mirroring NCF._init_weight_ (non-pretrained path)."""
    keys = jax.random.split(key, 16)
    ki = iter(range(16))
    mlp_embed_dim = FACTOR_NUM * 2 ** (NUM_LAYERS - 1)

    def normal(k, shape, std=0.01):
        return std * jax.random.normal(k, shape, dtype=jnp.float32)

    def xavier_uniform(k, fan_in, fan_out):
        limit = jnp.sqrt(6.0 / (fan_in + fan_out))
        # stored as [in, out] (pre-transposed PyTorch Linear weight)
        return jax.random.uniform(
            k, (fan_in, fan_out), dtype=jnp.float32, minval=-limit, maxval=limit
        )

    params = {
        "embed_user_GMF": normal(keys[next(ki)], (USER_NUM, FACTOR_NUM)),
        "embed_item_GMF": normal(keys[next(ki)], (ITEM_NUM, FACTOR_NUM)),
        "embed_user_MLP": normal(keys[next(ki)], (USER_NUM, mlp_embed_dim)),
        "embed_item_MLP": normal(keys[next(ki)], (ITEM_NUM, mlp_embed_dim)),
    }

    # MLP stack: input_size = F * 2^(L-i), output = input_size // 2
    mlp = []
    for i in range(NUM_LAYERS):
        in_sz = FACTOR_NUM * 2 ** (NUM_LAYERS - i)
        out_sz = in_sz // 2
        w = xavier_uniform(keys[next(ki)], in_sz, out_sz)
        b = jnp.zeros((1, out_sz), dtype=jnp.float32)
        mlp.append((w, b))
    params["mlp"] = mlp

    # Predict layer: kaiming_uniform(a=1, sigmoid) ~ uniform(+-sqrt(3/fan_in))
    predict_size = FACTOR_NUM if MODEL in ("MLP", "GMF") else FACTOR_NUM * 2
    limit = jnp.sqrt(3.0 / predict_size)
    params["w_predict"] = jax.random.uniform(
        keys[next(ki)], (predict_size, 1), dtype=jnp.float32,
        minval=-limit, maxval=limit,
    )
    params["b_predict"] = jnp.zeros((1, 1), dtype=jnp.float32)
    return params


# --------------------------- reference (pure JAX) -----------------------------
def ncf_forward_ref(user, item, params):
    gmf = params["embed_user_GMF"][user] * params["embed_item_GMF"][item]
    h = jnp.concatenate(
        [params["embed_user_MLP"][user], params["embed_item_MLP"][item]], axis=-1
    )
    for w, b in params["mlp"]:
        h = jnp.maximum(h @ w + b, 0.0)
    concat = jnp.concatenate([gmf, h], axis=-1)
    return (concat @ params["w_predict"] + params["b_predict"]).reshape(-1)


# ------------------------------- main -----------------------------------------
if __name__ == "__main__":
    key = jax.random.PRNGKey(0)
    k_params, k_user, k_item = jax.random.split(key, 3)

    params = init_params(k_params)
    kparams = prepare_kernel_params(params)

    user = jax.random.randint(k_user, (BATCH,), 0, USER_NUM, dtype=jnp.int32)
    item = jax.random.randint(k_item, (BATCH,), 0, ITEM_NUM, dtype=jnp.int32)

    pred = jax.block_until_ready(ncf_forward(user, item, kparams))
    ref = jax.block_until_ready(ncf_forward_ref(user, item, params))

    assert pred.shape == (BATCH,), pred.shape
    assert jnp.allclose(pred, ref, atol=1e-4, rtol=1e-4), (
        float(jnp.max(jnp.abs(pred - ref))))
    print("KERNEL_OK")
</pallas_src>

<mosaic_0001>
module attributes {stable_mosaic.version = 11 : i64} {
  func.func @kernel(%arg0: i32, %arg1: memref<128x1xi32, #tpu.memory_space<vmem>>, %arg2: memref<128x1xi32, #tpu.memory_space<vmem>>, %arg3: memref<128x16xf32, #tpu.memory_space<vmem>>, %arg4: memref<128x16xf32, #tpu.memory_space<vmem>>, %arg5: memref<128x64xf32, #tpu.memory_space<vmem>>, %arg6: memref<128x64xf32, #tpu.memory_space<vmem>>, %arg7: memref<1x64xf32, #tpu.memory_space<vmem>>, %arg8: memref<64x32xf32, #tpu.memory_space<vmem>>, %arg9: memref<1x32xf32, #tpu.memory_space<vmem>>, %arg10: memref<32x16xf32, #tpu.memory_space<vmem>>, %arg11: memref<1x16xf32, #tpu.memory_space<vmem>>, %arg12: memref<1x16xf32, #tpu.memory_space<vmem>>, %arg13: memref<1x16xf32, #tpu.memory_space<vmem>>, %arg14: memref<1x1xf32, #tpu.memory_space<vmem>>, %arg15: memref<128x1xf32, #tpu.memory_space<vmem>>) attributes {dimension_semantics = [#tpu.dimension_semantics<parallel>], iteration_bounds = array<i64: 2>, scalar_prefetch = 0 : i64, scratch_operands = 0 : i64, tpu.core_type = #tpu.core_type<tc>, window_params = [{transform_indices = @transform_0, window_bounds = array<i64: 128, 1>}, {transform_indices = @transform_1, window_bounds = array<i64: 128, 1>}, {pipeline_mode = #tpu.pipeline_mode<synchronous>, transform_indices = @transform_2, window_bounds = array<i64: 128, 16>}, {pipeline_mode = #tpu.pipeline_mode<synchronous>, transform_indices = @transform_3, window_bounds = array<i64: 128, 16>}, {pipeline_mode = #tpu.pipeline_mode<synchronous>, transform_indices = @transform_4, window_bounds = array<i64: 128, 64>}, {pipeline_mode = #tpu.pipeline_mode<synchronous>, transform_indices = @transform_5, window_bounds = array<i64: 128, 64>}, {pipeline_mode = #tpu.pipeline_mode<synchronous>, transform_indices = @transform_6, window_bounds = array<i64: 1, 64>}, {pipeline_mode = #tpu.pipeline_mode<synchronous>, transform_indices = @transform_7, window_bounds = array<i64: 64, 32>}, {pipeline_mode = #tpu.pipeline_mode<synchronous>, transform_indices = @transform_8, window_bounds = array<i64: 1, 32>}, {pipeline_mode = #tpu.pipeline_mode<synchronous>, transform_indices = @transform_9, window_bounds = array<i64: 32, 16>}, {pipeline_mode = #tpu.pipeline_mode<synchronous>, transform_indices = @transform_10, window_bounds = array<i64: 1, 16>}, {pipeline_mode = #tpu.pipeline_mode<synchronous>, transform_indices = @transform_11, window_bounds = array<i64: 1, 16>}, {pipeline_mode = #tpu.pipeline_mode<synchronous>, transform_indices = @transform_12, window_bounds = array<i64: 1, 16>}, {pipeline_mode = #tpu.pipeline_mode<synchronous>, transform_indices = @transform_13, window_bounds = array<i64: 1, 1>}, {transform_indices = @transform_14, window_bounds = array<i64: 128, 1>}]} {
    %c0 = arith.constant 0 : index
    %c0_0 = arith.constant 0 : index
    %0 = vector.load %arg1[%c0, %c0_0] : memref<128x1xi32, #tpu.memory_space<vmem>>, vector<128x1xi32>
    %1 = tpu.iota {dimensions = array<i32: 1>} : vector<128x128xi32>
    %2 = vector.broadcast %0 : vector<128x1xi32> to vector<128x128xi32>
    %3 = arith.cmpi eq, %2, %1 : vector<128x128xi32>
    %4 = arith.extui %3 : vector<128x128xi1> to vector<128x128xi32>
    %5 = arith.sitofp %4 : vector<128x128xi32> to vector<128x128xf32>
    %c0_1 = arith.constant 0 : index
    %c0_2 = arith.constant 0 : index
    %6 = vector.load %arg2[%c0_1, %c0_2] : memref<128x1xi32, #tpu.memory_space<vmem>>, vector<128x1xi32>
    %7 = tpu.iota {dimensions = array<i32: 1>} : vector<128x128xi32>
    %8 = vector.broadcast %6 : vector<128x1xi32> to vector<128x128xi32>
    %9 = arith.cmpi eq, %8, %7 : vector<128x128xi32>
    %10 = arith.extui %9 : vector<128x128xi1> to vector<128x128xi32>
    %11 = arith.sitofp %10 : vector<128x128xi32> to vector<128x128xf32>
    %c0_3 = arith.constant 0 : index
    %c0_4 = arith.constant 0 : index
    %12 = vector.load %arg3[%c0_3, %c0_4] : memref<128x16xf32, #tpu.memory_space<vmem>>, vector<128x16xf32>
    %cst = arith.constant dense<0.000000e+00> : vector<128x16xf32>
    %13 = tpu.matmul %5, %12, %cst {dimension_numbers = #tpu.dot_dimension_numbers<[1], [0], [0], [1], [0, 0, 1, 1], [], []>} : vector<128x128xf32>, vector<128x16xf32>, vector<128x16xf32> -> vector<128x16xf32>
    %c0_5 = arith.constant 0 : index
    %c0_6 = arith.constant 0 : index
    %14 = vector.load %arg4[%c0_5, %c0_6] : memref<128x16xf32, #tpu.memory_space<vmem>>, vector<128x16xf32>
    %cst_7 = arith.constant dense<0.000000e+00> : vector<128x16xf32>
    %15 = tpu.matmul %11, %14, %cst_7 {dimension_numbers = #tpu.dot_dimension_numbers<[1], [0], [0], [1], [0, 0, 1, 1], [], []>} : vector<128x128xf32>, vector<128x16xf32>, vector<128x16xf32> -> vector<128x16xf32>
    %16 = arith.mulf %13, %15 : vector<128x16xf32>
    %c0_8 = arith.constant 0 : index
    %c0_9 = arith.constant 0 : index
    %17 = vector.load %arg5[%c0_8, %c0_9] : memref<128x64xf32, #tpu.memory_space<vmem>>, vector<128x64xf32>
    %cst_10 = arith.constant dense<0.000000e+00> : vector<128x64xf32>
    %18 = tpu.matmul %5, %17, %cst_10 {dimension_numbers = #tpu.dot_dimension_numbers<[1], [0], [0], [1], [0, 0, 1, 1], [], []>} : vector<128x128xf32>, vector<128x64xf32>, vector<128x64xf32> -> vector<128x64xf32>
    %c0_11 = arith.constant 0 : index
    %c0_12 = arith.constant 0 : index
    %19 = vector.load %arg6[%c0_11, %c0_12] : memref<128x64xf32, #tpu.memory_space<vmem>>, vector<128x64xf32>
    %cst_13 = arith.constant dense<0.000000e+00> : vector<128x64xf32>
    %20 = tpu.matmul %11, %19, %cst_13 {dimension_numbers = #tpu.dot_dimension_numbers<[1], [0], [0], [1], [0, 0, 1, 1], [], []>} : vector<128x128xf32>, vector<128x64xf32>, vector<128x64xf32> -> vector<128x64xf32>
    %21 = arith.addf %18, %20 : vector<128x64xf32>
    %c0_14 = arith.constant 0 : index
    %c0_15 = arith.constant 0 : index
    %22 = vector.load %arg7[%c0_14, %c0_15] : memref<1x64xf32, #tpu.memory_space<vmem>>, vector<1x64xf32>
    %23 = vector.broadcast %22 : vector<1x64xf32> to vector<128x64xf32>
    %24 = arith.addf %21, %23 : vector<128x64xf32>
    %cst_16 = arith.constant 0.000000e+00 : f32
    %25 = vector.broadcast %cst_16 : f32 to vector<128x64xf32>
    %26 = arith.maximumf %24, %25 : vector<128x64xf32>
    %c0_17 = arith.constant 0 : index
    %c0_18 = arith.constant 0 : index
    %27 = vector.load %arg8[%c0_17, %c0_18] : memref<64x32xf32, #tpu.memory_space<vmem>>, vector<64x32xf32>
    %cst_19 = arith.constant dense<0.000000e+00> : vector<128x32xf32>
    %28 = tpu.matmul %26, %27, %cst_19 {dimension_numbers = #tpu.dot_dimension_numbers<[1], [0], [0], [1], [0, 0, 1, 1], [], []>} : vector<128x64xf32>, vector<64x32xf32>, vector<128x32xf32> -> vector<128x32xf32>
    %c0_20 = arith.constant 0 : index
    %c0_21 = arith.constant 0 : index
    %29 = vector.load %arg9[%c0_20, %c0_21] : memref<1x32xf32, #tpu.memory_space<vmem>>, vector<1x32xf32>
    %30 = vector.broadcast %29 : vector<1x32xf32> to vector<128x32xf32>
    %31 = arith.addf %28, %30 : vector<128x32xf32>
    %cst_22 = arith.constant 0.000000e+00 : f32
    %32 = vector.broadcast %cst_22 : f32 to vector<128x32xf32>
    %33 = arith.maximumf %31, %32 : vector<128x32xf32>
    %c0_23 = arith.constant 0 : index
    %c0_24 = arith.constant 0 : index
    %34 = vector.load %arg10[%c0_23, %c0_24] : memref<32x16xf32, #tpu.memory_space<vmem>>, vector<32x16xf32>
    %cst_25 = arith.constant dense<0.000000e+00> : vector<128x16xf32>
    %35 = tpu.matmul %33, %34, %cst_25 {dimension_numbers = #tpu.dot_dimension_numbers<[1], [0], [0], [1], [0, 0, 1, 1], [], []>} : vector<128x32xf32>, vector<32x16xf32>, vector<128x16xf32> -> vector<128x16xf32>
    %c0_26 = arith.constant 0 : index
    %c0_27 = arith.constant 0 : index
    %36 = vector.load %arg11[%c0_26, %c0_27] : memref<1x16xf32, #tpu.memory_space<vmem>>, vector<1x16xf32>
    %37 = vector.broadcast %36 : vector<1x16xf32> to vector<128x16xf32>
    %38 = arith.addf %35, %37 : vector<128x16xf32>
    %cst_28 = arith.constant 0.000000e+00 : f32
    %39 = vector.broadcast %cst_28 : f32 to vector<128x16xf32>
    %40 = arith.maximumf %38, %39 : vector<128x16xf32>
    %c0_29 = arith.constant 0 : index
    %c0_30 = arith.constant 0 : index
    %41 = vector.load %arg12[%c0_29, %c0_30] : memref<1x16xf32, #tpu.memory_space<vmem>>, vector<1x16xf32>
    %42 = vector.broadcast %41 : vector<1x16xf32> to vector<128x16xf32>
    %43 = arith.mulf %16, %42 : vector<128x16xf32>
    %cst_31 = arith.constant dense<0.000000e+00> : vector<128xf32>
    %44 = vector.multi_reduction <add>, %43, %cst_31 [1] : vector<128x16xf32> to vector<128xf32>
    %45 = vector.shape_cast %44 : vector<128xf32> to vector<128x1xf32>
    %c0_32 = arith.constant 0 : index
    %c0_33 = arith.constant 0 : index
    %46 = vector.load %arg13[%c0_32, %c0_33] : memref<1x16xf32, #tpu.memory_space<vmem>>, vector<1x16xf32>
    %47 = vector.broadcast %46 : vector<1x16xf32> to vector<128x16xf32>
    %48 = arith.mulf %40, %47 : vector<128x16xf32>
    %cst_34 = arith.constant dense<0.000000e+00> : vector<128xf32>
    %49 = vector.multi_reduction <add>, %48, %cst_34 [1] : vector<128x16xf32> to vector<128xf32>
    %50 = vector.shape_cast %49 : vector<128xf32> to vector<128x1xf32>
    %51 = arith.addf %45, %50 : vector<128x1xf32>
    %c0_35 = arith.constant 0 : index
    %c0_36 = arith.constant 0 : index
    %52 = vector.load %arg14[%c0_35, %c0_36] : memref<1x1xf32, #tpu.memory_space<vmem>>, vector<1x1xf32>
    %53 = vector.broadcast %52 : vector<1x1xf32> to vector<128x1xf32>
    %54 = arith.addf %51, %53 : vector<128x1xf32>
    %c0_37 = arith.constant 0 : index
    %c0_38 = arith.constant 0 : index
    %55 = vector.load %arg15[%c0_37, %c0_38] : memref<128x1xf32, #tpu.memory_space<vmem>>, vector<128x1xf32>
    tpu.vector_store %arg15[%c0_37, %c0_38], %54 {strides = array<i32>} : memref<128x1xf32, #tpu.memory_space<vmem>>, vector<128x1xf32>,
    return
  }
  func.func @transform_0(%arg0: i32) -> (i32, i32) {
    %c0_i32 = arith.constant 0 : i32
    %c0_i32_0 = arith.constant 0 : i32
    return %arg0, %c0_i32 : i32, i32
  }
  func.func @transform_1(%arg0: i32) -> (i32, i32) {
    %c0_i32 = arith.constant 0 : i32
    %c0_i32_0 = arith.constant 0 : i32
    return %arg0, %c0_i32 : i32, i32
  }
  func.func @transform_2(%arg0: i32) -> (i32, i32) {
    %c0_i32 = arith.constant 0 : i32
    %c0_i32_0 = arith.constant 0 : i32
    %c0_i32_1 = arith.constant 0 : i32
    return %c0_i32, %c0_i32_0 : i32, i32
  }
  func.func @transform_3(%arg0: i32) -> (i32, i32) {
    %c0_i32 = arith.constant 0 : i32
    %c0_i32_0 = arith.constant 0 : i32
    %c0_i32_1 = arith.constant 0 : i32
    return %c0_i32, %c0_i32_0 : i32, i32
  }
  func.func @transform_4(%arg0: i32) -> (i32, i32) {
    %c0_i32 = arith.constant 0 : i32
    %c0_i32_0 = arith.constant 0 : i32
    %c0_i32_1 = arith.constant 0 : i32
    return %c0_i32, %c0_i32_0 : i32, i32
  }
  func.func @transform_5(%arg0: i32) -> (i32, i32) {
    %c0_i32 = arith.constant 0 : i32
    %c0_i32_0 = arith.constant 0 : i32
    %c0_i32_1 = arith.constant 0 : i32
    return %c0_i32, %c0_i32_0 : i32, i32
  }
  func.func @transform_6(%arg0: i32) -> (i32, i32) {
    %c0_i32 = arith.constant 0 : i32
    %c0_i32_0 = arith.constant 0 : i32
    %c0_i32_1 = arith.constant 0 : i32
    return %c0_i32, %c0_i32_0 : i32, i32
  }
  func.func @transform_7(%arg0: i32) -> (i32, i32) {
    %c0_i32 = arith.constant 0 : i32
    %c0_i32_0 = arith.constant 0 : i32
    %c0_i32_1 = arith.constant 0 : i32
    return %c0_i32, %c0_i32_0 : i32, i32
  }
  func.func @transform_8(%arg0: i32) -> (i32, i32) {
    %c0_i32 = arith.constant 0 : i32
    %c0_i32_0 = arith.constant 0 : i32
    %c0_i32_1 = arith.constant 0 : i32
    return %c0_i32, %c0_i32_0 : i32, i32
  }
  func.func @transform_9(%arg0: i32) -> (i32, i32) {
    %c0_i32 = arith.constant 0 : i32
    %c0_i32_0 = arith.constant 0 : i32
    %c0_i32_1 = arith.constant 0 : i32
    return %c0_i32, %c0_i32_0 : i32, i32
  }
  func.func @transform_10(%arg0: i32) -> (i32, i32) {
    %c0_i32 = arith.constant 0 : i32
    %c0_i32_0 = arith.constant 0 : i32
    %c0_i32_1 = arith.constant 0 : i32
    return %c0_i32, %c0_i32_0 : i32, i32
  }
  func.func @transform_11(%arg0: i32) -> (i32, i32) {
    %c0_i32 = arith.constant 0 : i32
    %c0_i32_0 = arith.constant 0 : i32
    %c0_i32_1 = arith.constant 0 : i32
    return %c0_i32, %c0_i32_0 : i32, i32
  }
  func.func @transform_12(%arg0: i32) -> (i32, i32) {
    %c0_i32 = arith.constant 0 : i32
    %c0_i32_0 = arith.constant 0 : i32
    %c0_i32_1 = arith.constant 0 : i32
    return %c0_i32, %c0_i32_0 : i32, i32
  }
  func.func @transform_13(%arg0: i32) -> (i32, i32) {
    %c0_i32 = arith.constant 0 : i32
    %c0_i32_0 = arith.constant 0 : i32
    %c0_i32_1 = arith.constant 0 : i32
    return %c0_i32, %c0_i32_0 : i32, i32
  }
  func.func @transform_14(%arg0: i32) -> (i32, i32) {
    %c0_i32 = arith.constant 0 : i32
    %c0_i32_0 = arith.constant 0 : i32
    return %arg0, %c0_i32 : i32, i32
  }
}

</mosaic_0001>

<bundles_post_ra>
// kernel: ncf_forward.1
= control target key start
LH: loop header
LB: loop body
LE: loop exit
PB: predicated region body
PF: predicated region fallthrough
CT: control target
= control target key end

     0   :  { %s1915_s15 = smov 0   ;;  %s2749_s0 = inlined_call_operand.vmem [shape: s32[256,1], index: 0, kind: input, shape index: {}]   ;;  %s2750_s1 = inlined_call_operand.vmem [shape: s32[256,1], index: 1, kind: input, shape index: {}]   ;;  %s2751_s2 = inlined_call_operand.vmem [shape: f32[128,16], index: 2, kind: input, shape index: {}]   ;;  %s2752_s3 = inlined_call_operand.vmem [shape: f32[128,16], index: 3, kind: input, shape index: {}]   ;;  %s2753_s4 = inlined_call_operand.vmem [shape: f32[128,64], index: 4, kind: input, shape index: {}]   ;;  %s2754_s5 = inlined_call_operand.vmem [shape: f32[128,64], index: 5, kind: input, shape index: {}]   ;;  %s2755_s6 = inlined_call_operand.vmem [shape: f32[1,64], index: 6, kind: input, shape index: {}]   ;;  %s2756_s7 = inlined_call_operand.vmem [shape: f32[64,32], index: 7, kind: input, shape index: {}]   ;;  %s2757_s8 = inlined_call_operand.vmem [shape: f32[1,32], index: 8, kind: input, shape index: {}]   ;;  %s2758_s9 = inlined_call_operand.vmem [shape: f32[32,16], index: 9, kind: input, shape index: {}]   ;;  %s2759_s10 = inlined_call_operand.vmem [shape: f32[1,16], index: 10, kind: input, shape index: {}]   ;;  %s2760_s11 = inlined_call_operand.vmem [shape: f32[1,16], index: 11, kind: input, shape index: {}]   ;;  %s2761_s12 = inlined_call_operand.vmem [shape: f32[1,16], index: 12, kind: input, shape index: {}]   ;;  %s2762_s13 = inlined_call_operand.<no memory space> [shape: f32[1,1], index: 13, kind: input, shape index: {}]   ;;  %s2763_s14 = inlined_call_operand.vmem [shape: f32[256,1], index: 14, kind: output, shape index: {}]  }
   0x1   :  { %v19_v0 = vstv %s2762_s13 }
   0x2   :  { %20 = vst [vmem:[#allocation2] sm:$0x1] %v19_v0 }
   0x3 LB: > { %s1635_s16 = sadd.s32 4294967295, %s1833_s15   ;;  %p1639_p0 = scmp.ge.s32.totalorder %s1833_s15, 1  ;;  %s1833_s15 = sphi %s1915_s15, %s26_s15  }
   0x4   : > { %p426_p1 = scmp.lt.s32.totalorder %s1833_s15, 3 }
   0x6   : > { %p427_p2 = pnand %p1639_p0, %p426_p1 }
   0x7   : > { %s1640_s17 = sshll.u32 (!%p427_p2), %s1635_s16, 4 }
   0x8   : > { %430 = sbr.rel (%p427_p2) target bundleno = 849 (0x351), region = 76  ;;  %p478_p3 = scmp.lt.s32.totalorder (!%p427_p2), %s1640_s17, 31 }
   0xd   : > { %v1835_v1 = vmov 0   ;;  %s2787_s17 = smov (!%p478_p3, %s1640_s17), 31  ;;  %v736_v23 = vld [vmem:[%s2751_s2 + $0x78] sm:$0xff]  ;;  %v735_v24 = vld [vmem:[%s2751_s2 + $0x70] sm:$0xff]  ;;  %v734_v25 = vld [vmem:[%s2751_s2 + $0x68] sm:$0xff] }
   0xe   : > { %1820 = vset.pattern.permute.xlu2 %v1835_v1  ;;  %1819 = vset.pattern.permute.xlu1 %v1835_v1  ;;  %s1923_s13 = sshll.u32 %s2787_s17, 3  ;;  %v733_v29 = vld [vmem:[%s2751_s2 + $0x60] sm:$0xff]  ;;  %v732_v30 = vld [vmem:[%s2751_s2 + $0x58] sm:$0xff]  ;;  %v816_v32 = vld [vmem:[%s2752_s3 + $0x70] sm:$0xff] }
   0xf   : > { %1818 = vset.pattern.permute.xlu0 %v1835_v1  ;;  %s1929_s20 = scalar_lea.vmem %s2749_s0, %s1923_s13  ;;  %s1938_s23 = scalar_lea.vmem %s2750_s1, %s1923_s13  ;;  %1776 = vmatpush.msra.mxu2 %v736_v23  ;;  %v817_v31 = vld [vmem:[%s2752_s3 + $0x78] sm:$0xff]  ;;  %v731_v36 = vld [vmem:[%s2751_s2 + $0x50] sm:$0xff]  ;;  %v815_v37 = vld [vmem:[%s2752_s3 + $0x68] sm:$0xff] }
  0x10   : > { %v505_v2 = vld [vmem:[%s1929_s20 + $0x50] sm:$0xff]  ;;  %v504_v3 = vld [vmem:[%s1929_s20 + $0x48] sm:$0xff]  ;;  %v503_v4 = vld [vmem:[%s1929_s20 + $0x40] sm:$0xff]  ;;  %737 = vmatpush.msra.mxu0 %v736_v23  ;;  %1792 = vmatpush.msra.mxu3 %v817_v31  ;;  %s2687_s29 = scalar_lea.vmem %s2763_s14, %s1923_s13 }
  0x11   : > { %544 = vperm.xlu2 %1820, %v505_v2   ;;  %541 = vperm.xlu1 %1819, %v504_v3   ;;  %v619_v5 = vld [vmem:[%s1938_s23 + $0x50] sm:$0xff]  ;;  %v618_v6 = vld [vmem:[%s1938_s23 + $0x48] sm:$0xff]  ;;  %v617_v7 = vld [vmem:[%s1938_s23 + $0x40] sm:$0xff] }
  0x12   : > { %538 = vperm.xlu0 %1818, %v503_v4   ;;  %v507_v8 = vld [vmem:[%s1929_s20 + $0x60] sm:$0xff]  ;;  %v620_v9 = vld [vmem:[%s1938_s23 + $0x58] sm:$0xff]  ;;  %v622_v11 = vld [vmem:[%s1938_s23 + $0x68] sm:$0xff]  ;;  %1777 = vmatpush.msra.mxu2 %v735_v24 }
  0x13   : > { %v506_v10 = vld [vmem:[%s1929_s20 + $0x58] sm:$0xff]  ;;  %v508_v12 = vld [vmem:[%s1929_s20 + $0x68] sm:$0xff]  ;;  %v621_v13 = vld [vmem:[%s1938_s23 + $0x60] sm:$0xff]  ;;  %738 = vmatpush.msra.mxu0 %v735_v24  ;;  %818 = vmatpush.msra.mxu1 %v817_v31 }
  0x14   : > { %v510_v14 = vld [vmem:[%s1929_s20 + $0x78] sm:$0xff]  ;;  %v623_v15 = vld [vmem:[%s1938_s23 + $0x70] sm:$0xff]  ;;  %v609_v17 = vld [vmem:[%s1938_s23] sm:$0xff]  ;;  %1778 = vmatpush.msra.mxu2 %v734_v25  ;;  %1793 = vmatpush.msra.mxu3 %v816_v32 }
  0x15   : > { %v509_v16 = vld [vmem:[%s1929_s20 + $0x70] sm:$0xff]  ;;  %v495_v18 = vld [vmem:[%s1929_s20] sm:$0xff]  ;;  %v624_v19 = vld [vmem:[%s1938_s23 + $0x78] sm:$0xff]  ;;  %739 = vmatpush.msra.mxu0 %v734_v25  ;;  %819 = vmatpush.msra.mxu1 %v816_v32 }
  0x16   : > { %v497_v20 = vld [vmem:[%s1929_s20 + $0x10] sm:$0xff]  ;;  %v610_v21 = vld [vmem:[%s1938_s23 + $0x8] sm:$0xff]  ;;  %v612_v26 = vld [vmem:[%s1938_s23 + $0x18] sm:$0xff]  ;;  %1779 = vmatpush.msra.mxu2 %v733_v29  ;;  %1794 = vmatpush.msra.mxu3 %v815_v37 }
  0x17   : > { %v496_v22 = vld [vmem:[%s1929_s20 + $0x8] sm:$0xff]  ;;  %v498_v27 = vld [vmem:[%s1929_s20 + $0x18] sm:$0xff]  ;;  %v611_v28 = vld [vmem:[%s1938_s23 + $0x10] sm:$0xff]  ;;  %740 = vmatpush.msra.mxu0 %v733_v29  ;;  %820 = vmatpush.msra.mxu1 %v815_v37 }
  0x18   : > { %v500_v33 = vld [vmem:[%s1929_s20 + $0x28] sm:$0xff]  ;;  %v613_v34 = vld [vmem:[%s1938_s23 + $0x20] sm:$0xff]  ;;  %1780 = vmatpush.msra.mxu2 %v732_v30  ;;  %v728_v41 = vld [vmem:[%s2751_s2 + $0x38] sm:$0xff] }
  0x19   : > { %656 = vperm.xlu2 %1820, %v619_v5   ;;  %653 = vperm.xlu1 %1819, %v618_v6   ;;  %v499_v35 = vld [vmem:[%s1929_s20 + $0x20] sm:$0xff]  ;;  %v730_v38 = vld [vmem:[%s2751_s2 + $0x48] sm:$0xff]  ;;  %v813_v42 = vld [vmem:[%s2752_s3 + $0x58] sm:$0xff] }
  0x1a   : > { %650 = vperm.xlu0 %1818, %v617_v7   ;;  %741 = vmatpush.msra.mxu0 %v732_v30  ;;  %v729_v39 = vld [vmem:[%s2751_s2 + $0x40] sm:$0xff]  ;;  %v615_v43 = vld [vmem:[%s1938_s23 + $0x30] sm:$0xff]  ;;  %v614_v45 = vld [vmem:[%s1938_s23 + $0x28] sm:$0xff] }
  0x1b   : > { %1781 = vmatpush.msra.mxu2 %v731_v36  ;;  %v814_v40 = vld [vmem:[%s2752_s3 + $0x60] sm:$0xff]  ;;  %v501_v44 = vld [vmem:[%s1929_s20 + $0x30] sm:$0xff]  ;;  %v726_v48 = vld [vmem:[%s2751_s2 + $0x28] sm:$0xff] }
  0x1c   : > { %742 = vmatpush.msra.mxu0 %v731_v36  ;;  %1795 = vmatpush.msra.mxu3 %v814_v40  ;;  %v727_v46 = vld [vmem:[%s2751_s2 + $0x30] sm:$0xff]  ;;  %v811_v49 = vld [vmem:[%s2752_s3 + $0x48] sm:$0xff]  ;;  %v725_v50 = vld [vmem:[%s2751_s2 + $0x20] sm:$0xff] }
  0x1d   : > { %1782 = vmatpush.msra.mxu2 %v730_v38  ;;  %821 = vmatpush.msra.mxu1 %v814_v40  ;;  %v812_v47 = vld [vmem:[%s2752_s3 + $0x50] sm:$0xff]  ;;  %v810_v51 = vld [vmem:[%s2752_s3 + $0x40] sm:$0xff]  ;;  %v724_v52 = vld [vmem:[%s2751_s2 + $0x18] sm:$0xff] }
  0x1e   : > { %743 = vmatpush.msra.mxu0 %v730_v38  ;;  %1796 = vmatpush.msra.mxu3 %v813_v42  ;;  %v616_v53 = vld [vmem:[%s1938_s23 + $0x38] sm:$0xff]  ;;  %v723_v56 = vld [vmem:[%s2751_s2 + $0x10] sm:$0xff]  ;;  %v722_v58 = vld [vmem:[%s2751_s2 + $0x8] sm:$0xff] }
  0x1f   : > { %1783 = vmatpush.msra.mxu2 %v729_v39  ;;  %822 = vmatpush.msra.mxu1 %v813_v42  ;;  %v809_v54 = vld [vmem:[%s2752_s3 + $0x38] sm:$0xff]  ;;  %v808_v57 = vld [vmem:[%s2752_s3 + $0x30] sm:$0xff]  ;;  %v807_v59 = vld [vmem:[%s2752_s3 + $0x28] sm:$0xff] }
  0x20   : > { %744 = vmatpush.msra.mxu0 %v729_v39  ;;  %1797 = vmatpush.msra.mxu3 %v812_v47  ;;  %v502_v55 = vld [vmem:[%s1929_s20 + $0x38] sm:$0xff]  ;;  %v721_v60 = vld [vmem:[%s2751_s2] sm:$0xff]  ;;  %v804_v63 = vld [vmem:[%s2752_s3 + $0x10] sm:$0xff] }
  0x21   : > { %550 = vperm.xlu2 %1820, %v507_v8   ;;  %659 = vperm.xlu1 %1819, %v620_v9   ;;  %v806_v61 = vld [vmem:[%s2752_s3 + $0x20] sm:$0xff]  ;;  %v805_v62 = vld [vmem:[%s2752_s3 + $0x18] sm:$0xff]  ;;  %v803_v0 = vld [vmem:[%s2752_s3 + $0x8] sm:$0xff] }
  0x22   : > { %547 = vperm.xlu0 %1818, %v506_v10   ;;  %1784 = vmatpush.msra.mxu2 %v728_v41  ;;  %v802_v2 = vld [vmem:[%s2752_s3] sm:$0xff]  ;;  %v930_v3 = vld [vmem:[%s2754_s5 + $0x78] sm:$0xff]  ;;  %v929_v5 = vld [vmem:[%s2754_s5 + $0x70] sm:$0xff] }
  0x23   : > { %823 = vmatpush.msra.mxu1 %v812_v47  ;;  %745 = vmatpush.msra.mxu0 %v728_v41  ;;  %v914_v4 = vld [vmem:[%s2753_s4 + $0x78] sm:$0xff]  ;;  %v913_v6 = vld [vmem:[%s2753_s4 + $0x70] sm:$0xff]  ;;  %v928_v8 = vld [vmem:[%s2754_s5 + $0x68] sm:$0xff] }
  0x24   : > { %1785 = vmatpush.msra.mxu2 %v727_v46  ;;  %1798 = vmatpush.msra.mxu3 %v811_v49  ;;  %v912_v9 = vld [vmem:[%s2753_s4 + $0x68] sm:$0xff]  ;;  %v927_v10 = vld [vmem:[%s2754_s5 + $0x60] sm:$0xff]  ;;  %v922_v30 = vld [vmem:[%s2754_s5 + $0x38] sm:$0xff] }
  0x25   : > { %824 = vmatpush.msra.mxu1 %v811_v49  ;;  %746 = vmatpush.msra.mxu0 %v727_v46  ;;  %v924_v23 = vld [vmem:[%s2754_s5 + $0x48] sm:$0xff]  ;;  %v923_v25 = vld [vmem:[%s2754_s5 + $0x40] sm:$0xff]  ;;  %v906_v31 = vld [vmem:[%s2753_s4 + $0x38] sm:$0xff] }
  0x26   : > { %1786 = vmatpush.msra.mxu2 %v726_v48  ;;  %1799 = vmatpush.msra.mxu3 %v810_v51  ;;  %v908_v24 = vld [vmem:[%s2753_s4 + $0x48] sm:$0xff]  ;;  %v921_v32 = vld [vmem:[%s2754_s5 + $0x30] sm:$0xff]  ;;  %v919_v39 = vld [vmem:[%s2754_s5 + $0x20] sm:$0xff] }
  0x27   : > { %825 = vmatpush.msra.mxu1 %v810_v51  ;;  %747 = vmatpush.msra.mxu0 %v726_v48  ;;  %v920_v37 = vld [vmem:[%s2754_s5 + $0x28] sm:$0xff]  ;;  %v903_v40 = vld [vmem:[%s2753_s4 + $0x20] sm:$0xff]  ;;  %v901_v46 = vld [vmem:[%s2753_s4 + $0x10] sm:$0xff] }
  0x28   : > { %1787 = vmatpush.msra.mxu2 %v725_v50  ;;  %1800 = vmatpush.msra.mxu3 %v809_v54  ;;  %v904_v38 = vld [vmem:[%s2753_s4 + $0x28] sm:$0xff] }
  0x29   : > { %665 = vperm.xlu2 %1820, %v622_v11   ;;  %553 = vperm.xlu1 %1819, %v508_v12   ;;  %v911_v11 = vld [vmem:[%s2753_s4 + $0x60] sm:$0xff]  ;;  %v916_v47 = vld [vmem:[%s2754_s5 + $0x8] sm:$0xff] }
  0x2a   : > { %662 = vperm.xlu0 %1818, %v621_v13   ;;  %1788 = vmatpush.msra.mxu2 %v724_v52  ;;  %v511_v13 = vlaneseq  ;;  %v900_v51 = vld [vmem:[%s2753_s4 + $0x8] sm:$0xff] }
  0x2b   : > { %1801 = vmatpush.msra.mxu3 %v808_v57  ;;  %826 = vmatpush.msra.mxu1 %v809_v54 }
  0x2c   : > { %1789 = vmatpush.msra.mxu2 %v723_v56  ;;  %748 = vmatpush.msra.mxu0 %v725_v50  ;;  %v915_v50 = vld [vmem:[%s2754_s5] sm:$0xff] }
  0x2d   : > { %1802 = vmatpush.msra.mxu3 %v807_v59  ;;  %827 = vmatpush.msra.mxu1 %v808_v57 }
  0x2e   : > { %1790 = vmatpush.msra.mxu2 %v722_v58  ;;  %749 = vmatpush.msra.mxu0 %v724_v52  ;;  %v899_v52 = vld [vmem:[%s2753_s4] sm:$0xff] }
  0x2f   : > { %1803 = vmatpush.msra.mxu3 %v806_v61  ;;  %828 = vmatpush.msra.mxu1 %v807_v59 }
  0x30   : > { %1791 = vmatpush.msra.mxu2 %v721_v60  ;;  %750 = vmatpush.msra.mxu0 %v723_v56 }
  0x31   : > { %559 = vperm.xlu2 %1820, %v510_v14   ;;  %668 = vperm.xlu1 %1819, %v623_v15   ;;  %v926_v14 = vld [vmem:[%s2754_s5 + $0x58] sm:$0xff] }
  0x32   : > { %556 = vperm.xlu0 %1818, %v509_v16   ;;  %1804 = vmatpush.msra.mxu3 %v805_v62  ;;  %v910_v15 = vld [vmem:[%s2753_s4 + $0x58] sm:$0xff]  ;;  %v925_v16 = vld [vmem:[%s2754_s5 + $0x50] sm:$0xff] }
  0x33   : > { %829 = vmatpush.msra.mxu1 %v806_v61  ;;  %751 = vmatpush.msra.mxu0 %v722_v58 }
  0x34   : > { %1805 = vmatpush.msra.mxu3 %v804_v63  ;;  %931 = vmatpush.msrb.mxu2 %v930_v3 }
  0x35   : > { %830 = vmatpush.msra.mxu1 %v805_v62  ;;  %752 = vmatpush.msra.mxu0 %v721_v60 }
  0x36   : > { %1806 = vmatpush.msra.mxu3 %v803_v0  ;;  %932 = vmatpush.msrb.mxu2 %v929_v5 }
  0x37   : > { %831 = vmatpush.msra.mxu1 %v804_v63 }
  0x38   : > { %1807 = vmatpush.msra.mxu3 %v802_v2  ;;  %933 = vmatpush.msrb.mxu2 %v928_v8  ;;  %v1103_v8 = vld [vmem:[%s2756_s7 + $0x30] sm:$0xff] }
  0x39   : > { %626 = vperm.xlu2 %1820, %v609_v17   ;;  %514 = vperm.xlu1 %1819, %v495_v18   ;;  %v909_v17 = vld [vmem:[%s2753_s4 + $0x50] sm:$0xff]  ;;  %v2107_v18 = vand.u32 127, %v511_v13  ;;  %v2427_v13 = vld [vmem:[%s2760_s11] ss:$0 sm:$0xff] }
  0x3a   : > { %671 = vperm.xlu0 %1818, %v624_v19   ;;  %996 = vmatpush.msrb.mxu3 %v914_v4 }
  0x3b   : > { %832 = vmatpush.msra.mxu1 %v803_v0  ;;  %934 = vmatpush.msrb.mxu2 %v927_v10 }
  0x3c   : > { %997 = vmatpush.msrb.mxu3 %v913_v6  ;;  %v1104_v6 = vld [vmem:[%s2756_s7 + $0x38] sm:$0xff] }
  0x3d   : > { %833 = vmatpush.msra.mxu1 %v802_v2  ;;  %935 = vmatpush.msrb.mxu2 %v926_v14 }
  0x3e   : > { %998 = vmatpush.msrb.mxu3 %v912_v9  ;;  %1166 = vmatpush.msrb.mxu0 %v1104_v6  ;;  %v1102_v9 = vld [vmem:[%s2756_s7 + $0x28] sm:$0xff] }
  0x3f   : > { %936 = vmatpush.msrb.mxu2 %v925_v16 }
  0x40   : > { %999 = vmatpush.msrb.mxu3 %v911_v11  ;;  %1167 = vmatpush.msrb.mxu0 %v1103_v8  ;;  %v1101_v11 = vld [vmem:[%s2756_s7 + $0x20] sm:$0xff] }
  0x41   : > { %520 = vperm.xlu2 %1820, %v497_v20   ;;  %629 = vperm.xlu1 %1819, %v610_v21  }
  0x42   : > { %517 = vperm.xlu0 %1818, %v496_v22   ;;  %1000 = vmatpush.msrb.mxu3 %v910_v15  ;;  %v1836_v22 = vmov 1.0  }
  0x43   : > { %937 = vmatpush.msrb.mxu2 %v924_v23  ;;  %1168 = vmatpush.msrb.mxu0 %v1102_v9  ;;  %v1100_v23 = vld [vmem:[%s2756_s7 + $0x18] sm:$0xff] }
  0x44   : > { %1001 = vmatpush.msrb.mxu3 %v909_v17 }
  0x45   : > { %938 = vmatpush.msrb.mxu2 %v923_v25  ;;  %1169 = vmatpush.msrb.mxu0 %v1101_v11 }
  0x46   : > { %1002 = vmatpush.msrb.mxu3 %v908_v24 }
  0x47   : > { %939 = vmatpush.msrb.mxu2 %v922_v30  ;;  %1170 = vmatpush.msrb.mxu0 %v1100_v23 }
  0x49   : > { %635 = vperm.xlu2 %1820, %v612_v26   ;;  %523 = vperm.xlu1 %1819, %v498_v27   ;;  %v907_v26 = vld [vmem:[%s2753_s4 + $0x40] sm:$0xff] }
  0x4a   : > { %632 = vperm.xlu0 %1818, %v611_v28   ;;  %1003 = vmatpush.msrb.mxu3 %v907_v26 }
  0x4b   : > { %940 = vmatpush.msrb.mxu2 %v921_v32 }
  0x4c   : > { %1004 = vmatpush.msrb.mxu3 %v906_v31 }
  0x4d   : > { %941 = vmatpush.msrb.mxu2 %v920_v37 }
  0x4f   : > { %942 = vmatpush.msrb.mxu2 %v919_v39 }
  0x51   : > { %529 = vperm.xlu2 %1820, %v500_v33   ;;  %638 = vperm.xlu1 %1819, %v613_v34   ;;  %v905_v33 = vld [vmem:[%s2753_s4 + $0x30] sm:$0xff] }
  0x52   : > { %526 = vperm.xlu0 %1818, %v499_v35   ;;  %1005 = vmatpush.msrb.mxu3 %v905_v33 }
  0x54   : > { %1006 = vmatpush.msrb.mxu3 %v904_v38  ;;  %v1097_v38 = vld [vmem:[%s2756_s7] sm:$0xff] }
  0x56   : > { %1007 = vmatpush.msrb.mxu3 %v903_v40 }
  0x59   : > { %644 = vperm.xlu2 %1820, %v615_v43   ;;  %532 = vperm.xlu1 %1819, %v501_v44   ;;  %v918_v43 = vld [vmem:[%s2754_s5 + $0x18] sm:$0xff] }
  0x5a   : > { %641 = vperm.xlu0 %1818, %v614_v45   ;;  %v902_v44 = vld [vmem:[%s2753_s4 + $0x18] sm:$0xff]  ;;  %v917_v45 = vld [vmem:[%s2754_s5 + $0x10] sm:$0xff]  ;;  %943 = vmatpush.msrb.mxu2 %v918_v43 }
  0x5b   : > { %1008 = vmatpush.msrb.mxu3 %v902_v44 }
  0x5c   : > { %944 = vmatpush.msrb.mxu2 %v917_v45 }
  0x5d   : > { %1009 = vmatpush.msrb.mxu3 %v901_v46 }
  0x5e   : > { %945 = vmatpush.msrb.mxu2 %v916_v47 }
  0x5f   : > { %1010 = vmatpush.msrb.mxu3 %v900_v51 }
  0x60   : > { %946 = vmatpush.msrb.mxu2 %v915_v50 }
  0x61   : > { %647 = vperm.xlu1 %1819, %v616_v53   ;;  %1011 = vmatpush.msrb.mxu3 %v899_v52 }
  0x62   : > { %535 = vperm.xlu0 %1818, %v502_v55  }
  0x6b   : > { %v2062_v1 = vpop.permute.xlu2 %544 }
  0x6c   : > { %vm2768_vm3 = vcmp.eq.s32.totalorder %v2062_v1, %v2107_v18 }
  0x73   : > { %v2079_v7 = vpop.permute.xlu2 %656 }
  0x74   : > { %vm683_vm6 = vcmp.eq.s32.totalorder %v2079_v7, %v2107_v18 }
  0x7b   : > { %v2093_v12 = vpop.permute.xlu2 %550 }
  0x7c   : > { %vm2765_vm8 = vcmp.eq.s32.totalorder %v2093_v12, %v2107_v18 }
  0x83   : > { %v2109_v19 = vpop.permute.xlu2 %665  ;;  %v2111_v20 = vpop.permute.xlu1 %541 }
  0x84   : > { %v2113_v21 = vpop.permute.xlu0 %538  ;;  %vm570_vm1 = vcmp.eq.s32.totalorder %v2111_v20, %v2107_v18  ;;  %v1099_v20 = vld [vmem:[%s2756_s7 + $0x10] sm:$0xff] }
  0x85   : > { %vm569_vm0 = vcmp.eq.s32.totalorder %v2113_v21, %v2107_v18  ;;  %1171 = vmatpush.msrb.mxu0 %v1099_v20 }
  0x86   : > { %1686 = vmatmul.msk.f32.vlgmr.msra.gmra.mxu2 %vm569_vm0, %v1836_v22 }
  0x8b   : > { %v2135_v27 = vpop.permute.xlu2 %559  ;;  %v2137_v28 = vpop.permute.xlu1 %653 }
  0x8c   : > { %v2139_v29 = vpop.permute.xlu0 %650  ;;  %vm682_vm5 = vcmp.eq.s32.totalorder %v2137_v28, %v2107_v18 }
  0x8d   : > { %vm681_vm2 = vcmp.eq.s32.totalorder %v2139_v29, %v2107_v18 }
  0x8e   : > { %1687 = vmatmul.msk.f32.gmra.mxu2 %vm570_vm1, %v1836_v22  ;;  %1702 = vmatmul.msk.f32.vlgmr.msra.gmra.mxu3 %vm681_vm2, %v1836_v22 }
  0x93   : > { %v2165_v34 = vpop.permute.xlu2 %626  ;;  %v2167_v35 = vpop.permute.xlu1 %659 }
  0x94   : > { %vm673_vm4 = vcmp.eq.s32.totalorder %v2165_v34, %v2107_v18  ;;  %v2171_v36 = vpop.permute.xlu0 %547  ;;  %vm2771_vm9 = vcmp.eq.s32.totalorder %v2167_v35, %v2107_v18 }
  0x95   : > { %1694 = vmatmul.msk.f32.vlgmr.msra.gmra.mxu1 %vm673_vm4, %v1836_v22  ;;  %vm2766_vm7 = vcmp.eq.s32.totalorder %v2171_v36, %v2107_v18 }
  0x96   : > { %1688 = vmatmul.msk.f32.gmra.mxu2 %vm2768_vm3, %v1836_v22  ;;  %1703 = vmatmul.msk.f32.gmra.mxu3 %vm682_vm5, %v1836_v22 }
  0x9b   : > { %v2199_v41 = vpop.permute.xlu1 %553  ;;  %v521_v57 = vpop.permute.xlu2 %520 }
  0x9c   : > { %v2201_v42 = vpop.permute.xlu0 %662  ;;  %vm2764_vm11 = vcmp.eq.s32.totalorder %v2199_v41, %v2107_v18 }
  0x9d   : > { %vm2767_vm12 = vcmp.eq.s32.totalorder %v2201_v42, %v2107_v18 }
  0x9e   : > { %1689 = vmatmul.msk.f32.gmra.mxu2 %vm2766_vm7, %v1836_v22  ;;  %1704 = vmatmul.msk.f32.gmra.mxu3 %vm683_vm6, %v1836_v22  ;;  %vm563_vm7 = vcmp.eq.s32.totalorder %v521_v57, %v2107_v18 }
  0xa3   : > { %v2230_v48 = vpop.permute.xlu1 %668  ;;  %v636_v60 = vpop.permute.xlu2 %635 }
  0xa4   : > { %v2232_v49 = vpop.permute.xlu0 %556  ;;  %vm2773_vm3 = vcmp.eq.s32.totalorder %v2230_v48, %v2107_v18 }
  0xa5   : > { %vm2769_vm14 = vcmp.eq.s32.totalorder %v2232_v49, %v2107_v18 }
  0xa6   : > { %1690 = vmatmul.msk.f32.gmra.mxu2 %vm2765_vm8, %v1836_v22  ;;  %1705 = vmatmul.msk.f32.gmra.mxu3 %vm2771_vm9, %v1836_v22  ;;  %vm2772_vm8 = vcmp.eq.s32.totalorder %v2135_v27, %v2107_v18 }
  0xab   : > { %v515_v53 = vpop.permute.xlu1 %514  ;;  %v530_v63 = vpop.permute.xlu2 %529 }
  0xac   : > { %v2255_v54 = vpop.permute.xlu0 %671  ;;  %vm561_vm10 = vcmp.eq.s32.totalorder %v515_v53, %v2107_v18 }
  0xad   : > { %1678 = vmatmul.msk.f32.vlgmr.msra.gmra.mxu0 %vm561_vm10, %v1836_v22  ;;  %vm2774_vm9 = vcmp.eq.s32.totalorder %v2255_v54, %v2107_v18 }
  0xae   : > { %1691 = vmatmul.msk.f32.gmra.mxu2 %vm2764_vm11, %v1836_v22  ;;  %1706 = vmatmul.msk.f32.gmra.mxu3 %vm2767_vm12, %v1836_v22  ;;  %vm2770_vm11 = vcmp.eq.s32.totalorder %v2109_v19, %v2107_v18 }
  0xb3   : > { %v630_v55 = vpop.permute.xlu1 %629  ;;  %v645_v3 = vpop.permute.xlu2 %644 }
  0xb4   : > { %v518_v56 = vpop.permute.xlu0 %517  ;;  %vm674_vm13 = vcmp.eq.s32.totalorder %v630_v55, %v2107_v18 }
  0xb5   : > { %vm562_vm15 = vcmp.eq.s32.totalorder %v518_v56, %v2107_v18  ;;  %1695 = vmatmul.msk.f32.gmra.mxu1 %vm674_vm13, %v1836_v22 }
  0xb6   : > { %1679 = vmatmul.msk.f32.gmra.mxu0 %vm562_vm15, %v1836_v22  ;;  %1692 = vmatmul.msk.f32.gmra.mxu2 %vm2769_vm14, %v1836_v22 }
  0xb7   : > { %1707 = vmatmul.msk.f32.gmra.mxu3 %vm2770_vm11, %v1836_v22  ;;  %vm676_vm11 = vcmp.eq.s32.totalorder %v636_v60, %v2107_v18 }
  0xbb   : > { %v524_v59 = vpop.permute.xlu1 %523 }
  0xbc   : > { %v633_v58 = vpop.permute.xlu0 %632  ;;  %vm564_vm14 = vcmp.eq.s32.totalorder %v524_v59, %v2107_v18 }
  0xbd   : > { %vm675_vm12 = vcmp.eq.s32.totalorder %v633_v58, %v2107_v18 }
  0xbe   : > { %1680 = vmatmul.msk.f32.gmra.mxu0 %vm563_vm7, %v1836_v22  ;;  %1693 = vmatmul.msk.f32.gmra.mxu2 %vm2772_vm8, %v1836_v22 }
  0xbf   : > { %1696 = vmatmul.msk.f32.gmra.mxu1 %vm675_vm12, %v1836_v22  ;;  %1708 = vmatmul.msk.f32.gmra.mxu3 %vm2773_vm3, %v1836_v22 }
  0xc3   : > { %v639_v62 = vpop.permute.xlu1 %638 }
  0xc4   : > { %v527_v61 = vpop.permute.xlu0 %526  ;;  %vm677_vm3 = vcmp.eq.s32.totalorder %v639_v62, %v2107_v18 }
  0xc5   : > { %vm565_vm8 = vcmp.eq.s32.totalorder %v527_v61, %v2107_v18 }
  0xc6   : > { %1681 = vmatmul.msk.f32.gmra.mxu0 %vm564_vm14, %v1836_v22  ;;  %1710 = vmatmul.msk.f32.vlgmr.msrb.gmra.mxu2 %vm673_vm4, %v1836_v22  ;;  %vm566_vm4 = vcmp.eq.s32.totalorder %v530_v63, %v2107_v18 }
  0xc7   : > { %1697 = vmatmul.msk.f32.gmra.mxu1 %vm676_vm11, %v1836_v22  ;;  %1709 = vmatmul.msk.f32.gmra.mxu3 %vm2774_vm9, %v1836_v22 }
  0xcb   : > { %v533_v2 = vpop.permute.xlu1 %532 }
  0xcc   : > { %v642_v0 = vpop.permute.xlu0 %641 }
  0xcd   : > { %vm678_vm9 = vcmp.eq.s32.totalorder %v642_v0, %v2107_v18 }
  0xce   : > { %1682 = vmatmul.msk.f32.gmra.mxu0 %vm565_vm8, %v1836_v22  ;;  %1711 = vmatmul.msk.f32.gmra.mxu2 %vm674_vm13, %v1836_v22  ;;  %vm679_vm13 = vcmp.eq.s32.totalorder %v645_v3, %v2107_v18 }
  0xcf   : > { %1698 = vmatmul.msk.f32.gmra.mxu1 %vm677_vm3, %v1836_v22  ;;  %1726 = vmatmul.msk.f32.vlgmr.msrb.gmra.mxu3 %vm561_vm10, %v1836_v22  ;;  %vm567_vm10 = vcmp.eq.s32.totalorder %v533_v2, %v2107_v18 }
  0xd3   : > { %v648_v5 = vpop.permute.xlu1 %647 }
  0xd4   : > { %v536_v4 = vpop.permute.xlu0 %535 }
  0xd6   : > { %1683 = vmatmul.msk.f32.gmra.mxu0 %vm566_vm4, %v1836_v22  ;;  %1712 = vmatmul.msk.f32.gmra.mxu2 %vm675_vm12, %v1836_v22  ;;  %vm568_vm12 = vcmp.eq.s32.totalorder %v536_v4, %v2107_v18 }
  0xd7   : > { %1699 = vmatmul.msk.f32.gmra.mxu1 %vm678_vm9, %v1836_v22  ;;  %1727 = vmatmul.msk.f32.gmra.mxu3 %vm562_vm15, %v1836_v22  ;;  %vm680_vm15 = vcmp.eq.s32.totalorder %v648_v5, %v2107_v18 }
  0xde   : > { %1684 = vmatmul.msk.f32.gmra.mxu0 %vm567_vm10, %v1836_v22  ;;  %1713 = vmatmul.msk.f32.gmra.mxu2 %vm676_vm11, %v1836_v22  ;;  %vm2783_vm11 = vcmp.eq.s32.totalorder %v2255_v54, %v2107_v18 }
  0xdf   : > { %1700 = vmatmul.msk.f32.gmra.mxu1 %vm679_vm13, %v1836_v22  ;;  %1728 = vmatmul.msk.f32.gmra.mxu3 %vm563_vm7, %v1836_v22  ;;  %vm2780_vm7 = vcmp.eq.s32.totalorder %v2093_v12, %v2107_v18 }
  0xe6   : > { %1685 = vmatmul.msk.f32.gmra.mxu0 %vm568_vm12, %v1836_v22  ;;  %1714 = vmatmul.msk.f32.gmra.mxu2 %vm677_vm3, %v1836_v22  ;;  %vm2777_vm3 = vcmp.eq.s32.totalorder %v2201_v42, %v2107_v18 }
  0xe7   : > { %1701 = vmatmul.msk.f32.gmra.mxu1 %vm680_vm15, %v1836_v22  ;;  %1729 = vmatmul.msk.f32.gmra.mxu3 %vm564_vm14, %v1836_v22  ;;  %vm2784_vm14 = vcmp.eq.s32.totalorder %v2232_v49, %v2107_v18 }
  0xee   : > { %1715 = vmatmul.msk.f32.gmra.mxu2 %vm678_vm9, %v1836_v22  ;;  %vm2782_vm9 = vcmp.eq.s32.totalorder %v2199_v41, %v2107_v18 }
  0xef   : > { %1730 = vmatmul.msk.f32.gmra.mxu3 %vm565_vm8, %v1836_v22  ;;  %vm2781_vm8 = vcmp.eq.s32.totalorder %v2230_v48, %v2107_v18 }
  0xf6   : > { %1716 = vmatmul.msk.f32.gmra.mxu2 %vm679_vm13, %v1836_v22  ;;  %vm1247_vm13 = vcmask 261120  }
  0xf7   : > { %1731 = vmatmul.msk.f32.gmra.mxu3 %vm566_vm4, %v1836_v22  ;;  %vm2785_vm4 = vcmp.eq.s32.totalorder %v2135_v27, %v2107_v18 }
  0xfe   : > { %1717 = vmatmul.msk.f32.gmra.mxu2 %vm680_vm15, %v1836_v22 }
  0xff   : > { %1732 = vmatmul.msk.f32.gmra.mxu3 %vm567_vm10, %v1836_v22  ;;  %vm1109_vm10 = vcmask 523264  }
 0x106   : > { %1718 = vmatmul.msk.f32.gmra.mxu2 %vm681_vm2, %v1836_v22  ;;  %vm1397_vm2 = vcmask 130048  }
 0x107   : > { %1733 = vmatmul.msk.f32.gmra.mxu3 %vm568_vm12, %v1836_v22  ;;  %vm1550_vm12 = vcmask 7168  }
 0x109   : > { %v778_v10 = vpop.f32.mrf.mxu2 }
 0x10e   : > { %1719 = vmatmul.msk.f32.gmra.mxu2 %vm682_vm5, %v1836_v22  ;;  %vm2778_vm5 = vcmp.eq.s32.totalorder %v2171_v36, %v2107_v18 }
 0x10f   : > { %1734 = vmatmul.msk.f32.gmra.mxu3 %vm569_vm0, %v1836_v22  ;;  %vm2775_vm0 = vcmp.eq.s32.totalorder %v2167_v35, %v2107_v18 }
 0x111   : > { %v781_v14 = vpop.f32.mrf.mxu2  ;;  %v859_v15 = vpop.f32.mrf.mxu3 }
 0x112   : > { %v891_v16 = vmul.f32 %v859_v15, %v778_v10  ;;  %v835_v33 = vpop.f32.mrf.mxu1 }
 0x114   : > { %v1389_v17 = vmul.f32 %v2427_v13, %v891_v16 }
 0x116   : > { %1720 = vmatmul.msk.f32.gmra.mxu2 %vm683_vm6, %v1836_v22  ;;  %v1422_v21 = vsel %vm1397_vm2, %v1389_v17, 0.0  ;;  %vm2779_vm6 = vcmp.eq.s32.totalorder %v2109_v19, %v2107_v18 }
 0x117   : > { %1735 = vmatmul.msk.f32.gmra.mxu3 %vm570_vm1, %v1836_v22  ;;  %1423 = vadd.xlane.f32.xlu0 %v1422_v21  ;;  %vm2776_vm1 = vcmp.eq.s32.totalorder %v2062_v1, %v2107_v18  ;;  %v1098_v1 = vld [vmem:[%s2756_s7 + $0x8] sm:$0xff]  ;;  %v2515_v18 = vld [vmem:[%s2755_s6] ss:$0 sm:$0xff] }
 0x118   : > { %1172 = vmatpush.msrb.mxu0 %v1098_v1 }
 0x119   : > { %v784_v24 = vpop.f32.mrf.mxu2  ;;  %v862_v25 = vpop.f32.mrf.mxu3 }
 0x11a   : > { %v892_v26 = vmul.f32 %v862_v25, %v781_v14  ;;  %1173 = vmatpush.msrb.mxu0 %v1097_v38 }
 0x11c   : > { %v1390_v28 = vmul.f32 %v2427_v13, %v892_v26 }
 0x11e   : > { %1721 = vmatmul.msk.f32.gmra.mxu2 %vm2775_vm0, %v1836_v22  ;;  %v1425_v7 = vsel %vm1397_vm2, %v1390_v28, 0.0 }
 0x11f   : > { %1736 = vmatmul.msk.f32.gmra.mxu3 %vm2776_vm1, %v1836_v22  ;;  %1426 = vadd.xlane.f32.xlu1 %v1425_v7 }
 0x121   : > { %v787_v29 = vpop.f32.mrf.mxu2  ;;  %v865_v30 = vpop.f32.mrf.mxu3 }
 0x122   : > { %v893_v36 = vmul.f32 %v865_v30, %v784_v24 }
 0x124   : > { %v1391_v45 = vmul.f32 %v2427_v13, %v893_v36 }
 0x126   : > { %1722 = vmatmul.msk.f32.gmra.mxu2 %vm2777_vm3, %v1836_v22  ;;  %v1428_v12 = vsel %vm1397_vm2, %v1391_v45, 0.0 }
 0x127   : > { %1737 = vmatmul.msk.f32.gmra.mxu3 %vm2778_vm5, %v1836_v22 }
 0x129   : > { %v790_v31 = vpop.f32.mrf.mxu2  ;;  %v868_v32 = vpop.f32.mrf.mxu3 }
 0x12a   : > { %v754_v34 = vpop.f32.mrf.mxu0  ;;  %v894_v47 = vmul.f32 %v868_v32, %v787_v29 }
 0x12b   : > { %v883_v35 = vmul.f32 %v835_v33, %v754_v34 }
 0x12c   : > { %v1392_v48 = vmul.f32 %v2427_v13, %v894_v47 }
 0x12d   : > { %v1381_v37 = vmul.f32 %v2427_v13, %v883_v35 }
 0x12e   : > { %1723 = vmatmul.msk.f32.gmra.mxu2 %vm2779_vm6, %v1836_v22  ;;  %v1431_v57 = vsel %vm1397_vm2, %v1392_v48, 0.0 }
 0x12f   : > { %1738 = vmatmul.msk.f32.gmra.mxu3 %vm2780_vm7, %v1836_v22  ;;  %v1398_v39 = vsel %vm1397_vm2, %v1381_v37, 0.0 }
 0x130   : > { %1399 = vadd.xlane.f32.xlu2 %v1398_v39 }
 0x131   : > { %v793_v40 = vpop.f32.mrf.mxu2  ;;  %v871_v42 = vpop.f32.mrf.mxu3 }
 0x132   : > { %v838_v43 = vpop.f32.mrf.mxu1  ;;  %v895_v58 = vmul.f32 %v871_v42, %v790_v31 }
 0x133   : > { %v757_v44 = vpop.f32.mrf.mxu0 }
 0x134   : > { %v884_v46 = vmul.f32 %v838_v43, %v757_v44  ;;  %v1393_v0 = vmul.f32 %v2427_v13, %v895_v58 }
 0x136   : > { %1724 = vmatmul.msk.f32.gmra.mxu2 %vm2781_vm8, %v1836_v22  ;;  %v1382_v19 = vmul.f32 %v2427_v13, %v884_v46  ;;  %v1434_v3 = vsel %vm1397_vm2, %v1393_v0, 0.0 }
 0x137   : > { %1739 = vmatmul.msk.f32.gmra.mxu3 %vm2782_vm9, %v1836_v22 }
 0x138   : > { %1429 = vadd.xlane.f32.xlu2 %v1428_v12  ;;  %v1401_v50 = vsel %vm1397_vm2, %v1382_v19, 0.0 }
 0x139   : > { %v796_v51 = vpop.f32.mrf.mxu2  ;;  %1402 = vadd.xlane.f32.xlu0 %v1401_v50 }
 0x13a   : > { %v874_v52 = vpop.f32.mrf.mxu3 }
 0x13b   : > { %v760_v53 = vpop.f32.mrf.mxu0  ;;  %v896_v11 = vmul.f32 %v874_v52, %v793_v40 }
 0x13c   : > { %v841_v55 = vpop.f32.mrf.mxu1 }
 0x13d   : > { %v885_v56 = vmul.f32 %v841_v55, %v760_v53  ;;  %v1394_v24 = vmul.f32 %v2427_v13, %v896_v11 }
 0x13e   : > { %1725 = vmatmul.msk.f32.gmra.mxu2 %vm2783_vm11, %v1836_v22 }
 0x13f   : > { %1740 = vmatmul.msk.f32.gmra.mxu3 %vm2784_vm14, %v1836_v22  ;;  %v1383_v41 = vmul.f32 %v2427_v13, %v885_v56  ;;  %v1437_v20 = vsel %vm1397_vm2, %v1394_v24, 0.0 }
 0x141   : > { %v799_v59 = vpop.f32.mrf.mxu2  ;;  %1432 = vadd.xlane.f32.xlu0 %v1431_v57  ;;  %v1404_v60 = vsel %vm1397_vm2, %v1383_v41, 0.0 }
 0x142   : > { %v877_v61 = vpop.f32.mrf.mxu3  ;;  %1405 = vadd.xlane.f32.xlu1 %v1404_v60 }
 0x143   : > { %v763_v62 = vpop.f32.mrf.mxu0  ;;  %v897_v28 = vmul.f32 %v877_v61, %v796_v51 }
 0x144   : > { %v844_v63 = vpop.f32.mrf.mxu1 }
 0x145   : > { %v886_v54 = vmul.f32 %v844_v63, %v763_v62  ;;  %v1395_v35 = vmul.f32 %v2427_v13, %v897_v28 }
 0x147   : > { %1741 = vmatmul.msk.f32.gmra.mxu3 %vm2785_vm4, %v1836_v22  ;;  %v1384_v49 = vmul.f32 %v2427_v13, %v886_v54  ;;  %v1440_v40 = vsel %vm1397_vm2, %v1395_v35, 0.0 }
 0x149   : > { %v948_v2 = vpop.f32.mrf.mxu2  ;;  %v1407_v4 = vsel %vm1397_vm2, %v1384_v49, 0.0 }
 0x14a   : > { %v880_v5 = vpop.f32.mrf.mxu3  ;;  %1435 = vadd.xlane.f32.xlu1 %v1434_v3  ;;  %1408 = vadd.xlane.f32.xlu2 %v1407_v4 }
 0x14b   : > { %v766_v6 = vpop.f32.mrf.mxu0  ;;  %v898_v36 = vmul.f32 %v880_v5, %v799_v59 }
 0x14c   : > { %v847_v8 = vpop.f32.mrf.mxu1 }
 0x14d   : > { %v887_v9 = vmul.f32 %v847_v8, %v766_v6  ;;  %v1396_v47 = vmul.f32 %v2427_v13, %v898_v36  ;;  %v1239_v36 = vld [vmem:[%s2758_s9] sm:$0xff] }
 0x14f   : > { %v1385_v10 = vmul.f32 %v2427_v13, %v887_v9  ;;  %v1443_v53 = vsel %vm1397_vm2, %v1396_v47, 0.0 }
 0x151   : > { %v951_v14 = vpop.f32.mrf.mxu2  ;;  %v1410_v22 = vsel %vm1397_vm2, %v1385_v10, 0.0 }
 0x152   : > { %v1013_v27 = vpop.f32.mrf.mxu3  ;;  %1411 = vadd.xlane.f32.xlu2 %v1410_v22 }
 0x153   : > { %v1014_v15 = vadd.f32 %v1013_v27, %v948_v2  ;;  %v769_v16 = vpop.f32.mrf.mxu0  ;;  %v1242_v2 = vld [vmem:[%s2758_s9 + $0x18] sm:$0xff]  ;;  %v1241_v27 = vld [vmem:[%s2758_s9 + $0x10] sm:$0xff] }
 0x154   : > { %v850_v17 = vpop.f32.mrf.mxu1  ;;  %1308 = vmatpush.msrb.mxu1 %v1242_v2 }
 0x155   : > { %v1065_v21 = vadd.f32 %v2515_v18, %v1014_v15  ;;  %v888_v23 = vmul.f32 %v850_v17, %v769_v16 }
 0x156   : > { %1309 = vmatpush.msrb.mxu1 %v1241_v27 }
 0x157   : > { %v1081_v25 = vmax.f32 %v1065_v21, 0.0  ;;  %v1386_v26 = vmul.f32 %v2427_v13, %v888_v23 }
 0x159   : > { %1742 = vmatmul.msk.f32.vlgmr.msrb.gmra.mxu0 %vm1109_vm10, %v1081_v25  ;;  %v954_v7 = vpop.f32.mrf.mxu2  ;;  %v1413_v29 = vsel %vm1397_vm2, %v1386_v26, 0.0 }
 0x15a   : > { %v1016_v30 = vpop.f32.mrf.mxu3  ;;  %1438 = vadd.xlane.f32.xlu2 %v1437_v20  ;;  %1414 = vadd.xlane.f32.xlu0 %v1413_v29  ;;  %v1240_v20 = vld [vmem:[%s2758_s9 + $0x8] sm:$0xff] }
 0x15b   : > { %v1017_v1 = vadd.f32 %v1016_v30, %v951_v14  ;;  %v772_v31 = vpop.f32.mrf.mxu0  ;;  %1310 = vmatpush.msrb.mxu1 %v1240_v20 }
 0x15c   : > { %v853_v32 = vpop.f32.mrf.mxu1 }
 0x15d   : > { %v1066_v33 = vadd.f32 %v2515_v18, %v1017_v1  ;;  %v889_v34 = vmul.f32 %v853_v32, %v772_v31  ;;  %1311 = vmatpush.msrb.mxu1 %v1239_v36 }
 0x15f   : > { %v1082_v37 = vmax.f32 %v1066_v33, 0.0  ;;  %v1387_v38 = vmul.f32 %v2427_v13, %v889_v34 }
 0x161   : > { %1743 = vmatmul.msk.f32.gmra.mxu0 %vm1109_vm10, %v1082_v37  ;;  %v957_v39 = vpop.f32.mrf.mxu2  ;;  %v1416_v42 = vsel %vm1397_vm2, %v1387_v38, 0.0 }
 0x162   : > { %v1019_v43 = vpop.f32.mrf.mxu3  ;;  %1441 = vadd.xlane.f32.xlu0 %v1440_v40  ;;  %1417 = vadd.xlane.f32.xlu1 %v1416_v42 }
 0x163   : > { %v1020_v44 = vadd.f32 %v1019_v43, %v954_v7  ;;  %v775_v45 = vpop.f32.mrf.mxu0 }
 0x164   : > { %v856_v46 = vpop.f32.mrf.mxu1 }
 0x165   : > { %v1067_v19 = vadd.f32 %v2515_v18, %v1020_v44  ;;  %v890_v12 = vmul.f32 %v856_v46, %v775_v45 }
 0x167   : > { %v1083_v50 = vmax.f32 %v1067_v19, 0.0  ;;  %v1388_v51 = vmul.f32 %v2427_v13, %v890_v12 }
 0x169   : > { %1744 = vmatmul.msk.f32.gmra.mxu0 %vm1109_vm10, %v1083_v50  ;;  %v960_v52 = vpop.f32.mrf.mxu2  ;;  %v1419_v55 = vsel %vm1397_vm2, %v1388_v51, 0.0 }
 0x16a   : > { %v1022_v48 = vpop.f32.mrf.mxu3  ;;  %1444 = vadd.xlane.f32.xlu1 %v1443_v53  ;;  %1420 = vadd.xlane.f32.xlu2 %v1419_v55 }
 0x16b   : > { %v1023_v56 = vadd.f32 %v1022_v48, %v957_v39 }
 0x16d   : > { %v1068_v41 = vadd.f32 %v2515_v18, %v1023_v56 }
 0x16f   : > { %v1084_v57 = vmax.f32 %v1068_v41, 0.0 }
 0x171   : > { %1745 = vmatmul.msk.f32.gmra.mxu0 %vm1109_vm10, %v1084_v57  ;;  %v963_v58 = vpop.f32.mrf.mxu2 }
 0x172   : > { %v1025_v59 = vpop.f32.mrf.mxu3 }
 0x173   : > { %v1026_v60 = vadd.f32 %v1025_v59, %v960_v52 }
 0x175   : > { %v1069_v13 = vadd.f32 %v2515_v18, %v1026_v60 }
 0x177   : > { %v1085_v61 = vmax.f32 %v1069_v13, 0.0 }
 0x179   : > { %1746 = vmatmul.msk.f32.gmra.mxu0 %vm1109_vm10, %v1085_v61  ;;  %v966_v62 = vpop.f32.mrf.mxu2 }
 0x17a   : > { %v1028_v63 = vpop.f32.mrf.mxu3 }
 0x17b   : > { %v1029_v54 = vadd.f32 %v1028_v63, %v963_v58  ;;  %v2577_v58 = vld [vmem:[%s2757_s8] ss:$0 sm:$0xff] }
 0x17d   : > { %v1070_v0 = vadd.f32 %v2515_v18, %v1029_v54 }
 0x17f   : > { %v1086_v49 = vmax.f32 %v1070_v0, 0.0 }
 0x181   : > { %1747 = vmatmul.msk.f32.gmra.mxu0 %vm1109_vm10, %v1086_v49  ;;  %v969_v3 = vpop.f32.mrf.mxu2 }
 0x182   : > { %v1031_v4 = vpop.f32.mrf.mxu3 }
 0x183   : > { %v1032_v5 = vadd.f32 %v1031_v4, %v966_v62 }
 0x185   : > { %v1071_v6 = vadd.f32 %v2515_v18, %v1032_v5 }
 0x187   : > { %v1087_v8 = vmax.f32 %v1071_v6, 0.0 }
 0x189   : > { %1748 = vmatmul.msk.f32.gmra.mxu0 %vm1109_vm10, %v1087_v8  ;;  %v972_v9 = vpop.f32.mrf.mxu2 }
 0x18a   : > { %v1034_v10 = vpop.f32.mrf.mxu3 }
 0x18b   : > { %v1035_v11 = vadd.f32 %v1034_v10, %v969_v3 }
 0x18d   : > { %v1072_v14 = vadd.f32 %v2515_v18, %v1035_v11 }
 0x18f   : > { %v1088_v22 = vmax.f32 %v1072_v14, 0.0 }
 0x191   : > { %1749 = vmatmul.msk.f32.gmra.mxu0 %vm1109_vm10, %v1088_v22  ;;  %v975_v15 = vpop.f32.mrf.mxu2 }
 0x192   : > { %v1037_v16 = vpop.f32.mrf.mxu3 }
 0x193   : > { %v1038_v17 = vadd.f32 %v1037_v16, %v972_v9 }
 0x195   : > { %v1073_v21 = vadd.f32 %v2515_v18, %v1038_v17 }
 0x197   : > { %v1089_v23 = vmax.f32 %v1073_v21, 0.0 }
 0x199   : > { %1750 = vmatmul.msk.f32.gmra.mxu0 %vm1109_vm10, %v1089_v23  ;;  %v978_v24 = vpop.f32.mrf.mxu2 }
 0x19a   : > { %v1040_v25 = vpop.f32.mrf.mxu3 }
 0x19b   : > { %v1041_v26 = vadd.f32 %v1040_v25, %v975_v15 }
 0x19d   : > { %v1074_v28 = vadd.f32 %v2515_v18, %v1041_v26 }
 0x19f   : > { %v1090_v7 = vmax.f32 %v1074_v28, 0.0 }
 0x1a1   : > { %1751 = vmatmul.msk.f32.gmra.mxu0 %vm1109_vm10, %v1090_v7  ;;  %v981_v29 = vpop.f32.mrf.mxu2 }
 0x1a2   : > { %v1043_v30 = vpop.f32.mrf.mxu3 }
 0x1a3   : > { %v1044_v1 = vadd.f32 %v1043_v30, %v978_v24 }
 0x1a5   : > { %v1075_v31 = vadd.f32 %v2515_v18, %v1044_v1 }
 0x1a7   : > { %v1091_v32 = vmax.f32 %v1075_v31, 0.0 }
 0x1a9   : > { %1752 = vmatmul.msk.f32.gmra.mxu0 %vm1109_vm10, %v1091_v32  ;;  %v984_v35 = vpop.f32.mrf.mxu2 }
 0x1aa   : > { %v1046_v33 = vpop.f32.mrf.mxu3 }
 0x1ab   : > { %v1047_v34 = vadd.f32 %v1046_v33, %v981_v29 }
 0x1ad   : > { %v1076_v37 = vadd.f32 %v2515_v18, %v1047_v34 }
 0x1af   : > { %v1092_v38 = vmax.f32 %v1076_v37, 0.0 }
 0x1b1   : > { %1753 = vmatmul.msk.f32.gmra.mxu0 %vm1109_vm10, %v1092_v38  ;;  %v987_v43 = vpop.f32.mrf.mxu2 }
 0x1b2   : > { %v1049_v39 = vpop.f32.mrf.mxu3 }
 0x1b3   : > { %v1050_v40 = vadd.f32 %v1049_v39, %v984_v35 }
 0x1b5   : > { %v1077_v42 = vadd.f32 %v2515_v18, %v1050_v40 }
 0x1b7   : > { %v1093_v44 = vmax.f32 %v1077_v42, 0.0 }
 0x1b9   : > { %1754 = vmatmul.msk.f32.gmra.mxu0 %vm1109_vm10, %v1093_v44  ;;  %v990_v47 = vpop.f32.mrf.mxu2  ;;  %v2614_v44 = vld [vmem:[%s2759_s10] ss:$0 sm:$0xff] }
 0x1ba   : > { %v1052_v45 = vpop.f32.mrf.mxu3 }
 0x1bb   : > { %v1053_v46 = vadd.f32 %v1052_v45, %v987_v43 }
 0x1bd   : > { %v1078_v19 = vadd.f32 %v2515_v18, %v1053_v46 }
 0x1bf   : > { %v1094_v12 = vmax.f32 %v1078_v19, 0.0  ;;  %v2620_v19 = vld [vmem:[%s2761_s12] ss:$0 sm:$0xff] }
 0x1c1   : > { %1755 = vmatmul.msk.f32.gmra.mxu0 %vm1109_vm10, %v1094_v12  ;;  %v993_v55 = vpop.f32.mrf.mxu2 }
 0x1c2   : > { %v1055_v50 = vpop.f32.mrf.mxu3 }
 0x1c3   : > { %v1056_v51 = vadd.f32 %v1055_v50, %v990_v47 }
 0x1c5   : > { %v1079_v52 = vadd.f32 %v2515_v18, %v1056_v51 }
 0x1c7   : > { %v1095_v53 = vmax.f32 %v1079_v52, 0.0 }
 0x1c9   : > { %1756 = vmatmul.msk.f32.gmra.mxu0 %vm1109_vm10, %v1095_v53 }
 0x1ca   : > { %v1058_v48 = vpop.f32.mrf.mxu3 }
 0x1cb   : > { %v1059_v56 = vadd.f32 %v1058_v48, %v993_v55 }
 0x1cd   : > { %v1080_v41 = vadd.f32 %v2515_v18, %v1059_v56 }
 0x1cf   : > { %v1096_v57 = vmax.f32 %v1080_v41, 0.0 }
 0x1d1   : > { %1757 = vmatmul.msk.f32.gmra.mxu0 %vm1109_vm10, %v1096_v57 }
 0x1d6   : > { %v1175_v59 = vpop.f32.mrf.mxu0 }
 0x1d7   : > { %v1176_v60 = vadd.f32 %v2577_v58, %v1175_v59 }
 0x1d9   : > { %v1223_v13 = vmax.f32 %v1176_v60, 0.0 }
 0x1db   : > { %1758 = vmatmul.msk.f32.vlgmr.msrb.gmra.mxu1 %vm1247_vm13, %v1223_v13 }
 0x1de   : > { %v1178_v61 = vpop.f32.mrf.mxu0 }
 0x1df   : > { %v1179_v62 = vadd.f32 %v2577_v58, %v1178_v61 }
 0x1e1   : > { %v1224_v63 = vmax.f32 %v1179_v62, 0.0 }
 0x1e3   : > { %1759 = vmatmul.msk.f32.gmra.mxu1 %vm1247_vm13, %v1224_v63 }
 0x1e6   : > { %v1181_v18 = vpop.f32.mrf.mxu0 }
 0x1e7   : > { %v1182_v54 = vadd.f32 %v2577_v58, %v1181_v18 }
 0x1e9   : > { %v1225_v0 = vmax.f32 %v1182_v54, 0.0 }
 0x1eb   : > { %1760 = vmatmul.msk.f32.gmra.mxu1 %vm1247_vm13, %v1225_v0 }
 0x1ee   : > { %v1184_v49 = vpop.f32.mrf.mxu0 }
 0x1ef   : > { %v1185_v2 = vadd.f32 %v2577_v58, %v1184_v49 }
 0x1f1   : > { %v1226_v3 = vmax.f32 %v1185_v2, 0.0 }
 0x1f3   : > { %1761 = vmatmul.msk.f32.gmra.mxu1 %vm1247_vm13, %v1226_v3 }
 0x1f6   : > { %v1187_v4 = vpop.f32.mrf.mxu0 }
 0x1f7   : > { %v1188_v5 = vadd.f32 %v2577_v58, %v1187_v4 }
 0x1f9   : > { %v1227_v6 = vmax.f32 %v1188_v5, 0.0 }
 0x1fb   : > { %1762 = vmatmul.msk.f32.gmra.mxu1 %vm1247_vm13, %v1227_v6 }
 0x1fe   : > { %v1190_v8 = vpop.f32.mrf.mxu0 }
 0x1ff   : > { %v1191_v9 = vadd.f32 %v2577_v58, %v1190_v8 }
 0x201   : > { %v1228_v10 = vmax.f32 %v1191_v9, 0.0 }
 0x203   : > { %1763 = vmatmul.msk.f32.gmra.mxu1 %vm1247_vm13, %v1228_v10 }
 0x206   : > { %v1193_v11 = vpop.f32.mrf.mxu0 }
 0x207   : > { %v1194_v14 = vadd.f32 %v2577_v58, %v1193_v11 }
 0x209   : > { %v1229_v22 = vmax.f32 %v1194_v14, 0.0 }
 0x20b   : > { %1764 = vmatmul.msk.f32.gmra.mxu1 %vm1247_vm13, %v1229_v22 }
 0x20e   : > { %v1196_v27 = vpop.f32.mrf.mxu0 }
 0x20f   : > { %v1197_v15 = vadd.f32 %v2577_v58, %v1196_v27 }
 0x211   : > { %v1230_v16 = vmax.f32 %v1197_v15, 0.0 }
 0x213   : > { %1765 = vmatmul.msk.f32.gmra.mxu1 %vm1247_vm13, %v1230_v16 }
 0x216   : > { %v1199_v17 = vpop.f32.mrf.mxu0 }
 0x217   : > { %v1200_v21 = vadd.f32 %v2577_v58, %v1199_v17 }
 0x219   : > { %v1231_v23 = vmax.f32 %v1200_v21, 0.0 }
 0x21b   : > { %1766 = vmatmul.msk.f32.gmra.mxu1 %vm1247_vm13, %v1231_v23 }
 0x21e   : > { %v1202_v24 = vpop.f32.mrf.mxu0 }
 0x21f   : > { %v1203_v25 = vadd.f32 %v2577_v58, %v1202_v24 }
 0x221   : > { %v1232_v26 = vmax.f32 %v1203_v25, 0.0 }
 0x223   : > { %1767 = vmatmul.msk.f32.gmra.mxu1 %vm1247_vm13, %v1232_v26  ;;  %v1400_v26 = vpop.xlane.xlu2 %1399 }
 0x226   : > { %v1205_v28 = vpop.f32.mrf.mxu0 }
 0x227   : > { %v1206_v7 = vadd.f32 %v2577_v58, %v1205_v28 }
 0x229   : > { %v1233_v20 = vmax.f32 %v1206_v7, 0.0 }
 0x22b   : > { %1768 = vmatmul.msk.f32.gmra.mxu1 %vm1247_vm13, %v1233_v20 }
 0x22e   : > { %v1208_v29 = vpop.f32.mrf.mxu0 }
 0x22f   : > { %v1209_v30 = vadd.f32 %v2577_v58, %v1208_v29 }
 0x231   : > { %v1234_v1 = vmax.f32 %v1209_v30, 0.0 }
 0x233   : > { %1769 = vmatmul.msk.f32.gmra.mxu1 %vm1247_vm13, %v1234_v1 }
 0x236   : > { %v1211_v31 = vpop.f32.mrf.mxu0 }
 0x237   : > { %v1212_v32 = vadd.f32 %v2577_v58, %v1211_v31  ;;  %v2650_v31 = vpop.xlane.xlu2 %1429 }
 0x239   : > { %v1235_v33 = vmax.f32 %v1212_v32, 0.0 }
 0x23b   : > { %1770 = vmatmul.msk.f32.gmra.mxu1 %vm1247_vm13, %v1235_v33 }
 0x23e   : > { %v1214_v34 = vpop.f32.mrf.mxu0 }
 0x23f   : > { %v1215_v35 = vadd.f32 %v2577_v58, %v1214_v34 }
 0x241   : > { %v1236_v37 = vmax.f32 %v1215_v35, 0.0 }
 0x243   : > { %1771 = vmatmul.msk.f32.gmra.mxu1 %vm1247_vm13, %v1236_v37 }
 0x246   : > { %v1217_v38 = vpop.f32.mrf.mxu0 }
 0x247   : > { %v1218_v36 = vadd.f32 %v2577_v58, %v1217_v38  ;;  %v2655_v38 = vpop.xlane.xlu0 %1423 }
 0x249   : > { %v1237_v39 = vmax.f32 %v1218_v36, 0.0  ;;  %v1409_v36 = vpop.xlane.xlu2 %1408 }
 0x24b   : > { %1772 = vmatmul.msk.f32.gmra.mxu1 %vm1247_vm13, %v1237_v39 }
 0x24e   : > { %v1220_v40 = vpop.f32.mrf.mxu0 }
 0x24f   : > { %v1221_v42 = vadd.f32 %v2577_v58, %v1220_v40 }
 0x251   : > { %v1238_v43 = vmax.f32 %v1221_v42, 0.0 }
 0x253   : > { %1773 = vmatmul.msk.f32.gmra.mxu1 %vm1247_vm13, %v1238_v43 }
 0x258   : > { %v1313_v45 = vpop.f32.mrf.mxu1 }
 0x259   : > { %v1314_v46 = vadd.f32 %v2614_v44, %v1313_v45 }
 0x25b   : > { %v1361_v12 = vmax.f32 %v1314_v46, 0.0  ;;  %v2660_v46 = vpop.xlane.xlu1 %1426 }
 0x25d   : > { %v1450_v47 = vmul.f32 %v2620_v19, %v1361_v12  ;;  %v1403_v12 = vpop.xlane.xlu0 %1402 }
 0x25f   : > { %v1466_v50 = vsel %vm1397_vm2, %v1450_v47, 0.0 }
 0x260   : > { %v1316_v51 = vpop.f32.mrf.mxu1  ;;  %1467 = vadd.xlane.f32.xlu2 %v1466_v50 }
 0x261   : > { %v1317_v52 = vadd.f32 %v2614_v44, %v1316_v51  ;;  %v1412_v51 = vpop.xlane.xlu2 %1411 }
 0x263   : > { %v1362_v53 = vmax.f32 %v1317_v52, 0.0 }
 0x265   : > { %v1451_v55 = vmul.f32 %v2620_v19, %v1362_v53 }
 0x267   : > { %v1469_v48 = vsel %vm1397_vm2, %v1451_v55, 0.0 }
 0x268   : > { %v1319_v56 = vpop.f32.mrf.mxu1  ;;  %1470 = vadd.xlane.f32.xlu0 %v1469_v48  ;;  %v1406_v48 = vpop.xlane.xlu1 %1405 }
 0x269   : > { %v1320_v41 = vadd.f32 %v2614_v44, %v1319_v56 }
 0x26b   : > { %v1363_v57 = vmax.f32 %v1320_v41, 0.0 }
 0x26d   : > { %v1452_v58 = vmul.f32 %v2620_v19, %v1363_v57  ;;  %v2666_v57 = vpop.xlane.xlu0 %1432 }
 0x26f   : > { %v1472_v59 = vsel %vm1397_vm2, %v1452_v58, 0.0 }
 0x270   : > { %v1322_v60 = vpop.f32.mrf.mxu1  ;;  %1473 = vadd.xlane.f32.xlu1 %v1472_v59  ;;  %v2669_v59 = vpop.xlane.xlu2 %1438 }
 0x271   : > { %v1323_v13 = vadd.f32 %v2614_v44, %v1322_v60 }
 0x273   : > { %v1364_v61 = vmax.f32 %v1323_v13, 0.0 }
 0x275   : > { %v1453_v62 = vmul.f32 %v2620_v19, %v1364_v61 }
 0x277   : > { %v1475_v63 = vsel %vm1397_vm2, %v1453_v62, 0.0 }
 0x278   : > { %v1325_v18 = vpop.f32.mrf.mxu1  ;;  %1476 = vadd.xlane.f32.xlu2 %v1475_v63  ;;  %v2673_v63 = vpop.xlane.xlu1 %1435 }
 0x279   : > { %v1326_v54 = vadd.f32 %v2614_v44, %v1325_v18  ;;  %v1415_v18 = vpop.xlane.xlu0 %1414 }
 0x27b   : > { %v1365_v0 = vmax.f32 %v1326_v54, 0.0 }
 0x27d   : > { %v1454_v49 = vmul.f32 %v2620_v19, %v1365_v0  ;;  %v1421_v0 = vpop.xlane.xlu2 %1420 }
 0x27f   : > { %v1478_v2 = vsel %vm1397_vm2, %v1454_v49, 0.0 }
 0x280   : > { %v1328_v3 = vpop.f32.mrf.mxu1  ;;  %1479 = vadd.xlane.f32.xlu0 %v1478_v2 }
 0x281   : > { %v1329_v4 = vadd.f32 %v2614_v44, %v1328_v3 }
 0x283   : > { %v1366_v5 = vmax.f32 %v1329_v4, 0.0 }
 0x285   : > { %v1455_v6 = vmul.f32 %v2620_v19, %v1366_v5  ;;  %v1418_v5 = vpop.xlane.xlu1 %1417 }
 0x287   : > { %v1481_v8 = vsel %vm1397_vm2, %v1455_v6, 0.0 }
 0x288   : > { %v1331_v9 = vpop.f32.mrf.mxu1  ;;  %1482 = vadd.xlane.f32.xlu1 %v1481_v8  ;;  %v2679_v8 = vld [vmem:[#allocation2] ss:$0 sm:$0xff] }
 0x289   : > { %v1332_v10 = vadd.f32 %v2614_v44, %v1331_v9  ;;  %v2681_v9 = vpop.xlane.xlu0 %1441 }
 0x28b   : > { %v1367_v11 = vmax.f32 %v1332_v10, 0.0 }
 0x28d   : > { %v1456_v14 = vmul.f32 %v2620_v19, %v1367_v11 }
 0x28f   : > { %v1484_v22 = vsel %vm1397_vm2, %v1456_v14, 0.0 }
 0x290   : > { %v1334_v27 = vpop.f32.mrf.mxu1  ;;  %1485 = vadd.xlane.f32.xlu2 %v1484_v22 }
 0x291   : > { %v1335_v15 = vadd.f32 %v2614_v44, %v1334_v27 }
 0x293   : > { %v1368_v16 = vmax.f32 %v1335_v15, 0.0  ;;  %v1445_v15 = vpop.xlane.xlu1 %1444 }
 0x295   : > { %v1457_v17 = vmul.f32 %v2620_v19, %v1368_v16 }
 0x297   : > { %v1487_v21 = vsel %vm1397_vm2, %v1457_v17, 0.0 }
 0x298   : > { %v1337_v23 = vpop.f32.mrf.mxu1  ;;  %1488 = vadd.xlane.f32.xlu0 %v1487_v21 }
 0x299   : > { %v1338_v24 = vadd.f32 %v2614_v44, %v1337_v23 }
 0x29b   : > { %v1369_v25 = vmax.f32 %v1338_v24, 0.0 }
 0x29d   : > { %v1458_v28 = vmul.f32 %v2620_v19, %v1369_v25 }
 0x29f   : > { %v1490_v7 = vsel %vm1397_vm2, %v1458_v28, 0.0 }
 0x2a0   : > { %v1340_v20 = vpop.f32.mrf.mxu1  ;;  %1491 = vadd.xlane.f32.xlu1 %v1490_v7 }
 0x2a1   : > { %v1341_v29 = vadd.f32 %v2614_v44, %v1340_v20 }
 0x2a3   : > { %v1370_v30 = vmax.f32 %v1341_v29, 0.0 }
 0x2a5   : > { %v1459_v1 = vmul.f32 %v2620_v19, %v1370_v30 }
 0x2a7   : > { %v1493_v32 = vsel %vm1397_vm2, %v1459_v1, 0.0 }
 0x2a8   : > { %v1343_v33 = vpop.f32.mrf.mxu1  ;;  %1494 = vadd.xlane.f32.xlu2 %v1493_v32 }
 0x2a9   : > { %v1344_v34 = vadd.f32 %v2614_v44, %v1343_v33 }
 0x2ab   : > { %v1371_v35 = vmax.f32 %v1344_v34, 0.0 }
 0x2ad   : > { %v1460_v37 = vmul.f32 %v2620_v19, %v1371_v35 }
 0x2af   : > { %v1496_v39 = vsel %vm1397_vm2, %v1460_v37, 0.0 }
 0x2b0   : > { %v1346_v40 = vpop.f32.mrf.mxu1  ;;  %1497 = vadd.xlane.f32.xlu0 %v1496_v39 }
 0x2b1   : > { %v1347_v42 = vadd.f32 %v2614_v44, %v1346_v40 }
 0x2b3   : > { %v1372_v43 = vmax.f32 %v1347_v42, 0.0 }
 0x2b5   : > { %v1461_v45 = vmul.f32 %v2620_v19, %v1372_v43 }
 0x2b7   : > { %v1499_v47 = vsel %vm1397_vm2, %v1461_v45, 0.0 }
 0x2b8   : > { %v1349_v50 = vpop.f32.mrf.mxu1  ;;  %1500 = vadd.xlane.f32.xlu1 %v1499_v47 }
 0x2b9   : > { %v1350_v52 = vadd.f32 %v2614_v44, %v1349_v50 }
 0x2bb   : > { %v1373_v53 = vmax.f32 %v1350_v52, 0.0 }
 0x2bd   : > { %v1462_v55 = vmul.f32 %v2620_v19, %v1373_v53 }
 0x2bf   : > { %v1502_v56 = vsel %vm1397_vm2, %v1462_v55, 0.0 }
 0x2c0   : > { %v1352_v41 = vpop.f32.mrf.mxu1  ;;  %1503 = vadd.xlane.f32.xlu2 %v1502_v56 }
 0x2c1   : > { %v1353_v58 = vadd.f32 %v2614_v44, %v1352_v41 }
 0x2c3   : > { %v1374_v60 = vmax.f32 %v1353_v58, 0.0 }
 0x2c5   : > { %v1463_v13 = vmul.f32 %v2620_v19, %v1374_v60 }
 0x2c7   : > { %v1505_v61 = vsel %vm1397_vm2, %v1463_v13, 0.0 }
 0x2c8   : > { %v1355_v62 = vpop.f32.mrf.mxu1  ;;  %1506 = vadd.xlane.f32.xlu0 %v1505_v61 }
 0x2c9   : > { %v1356_v54 = vadd.f32 %v2614_v44, %v1355_v62 }
 0x2cb   : > { %v1375_v49 = vmax.f32 %v1356_v54, 0.0 }
 0x2cd   : > { %v1464_v2 = vmul.f32 %v2620_v19, %v1375_v49 }
 0x2cf   : > { %v1508_v3 = vsel %vm1397_vm2, %v1464_v2, 0.0 }
 0x2d0   : > { %v1358_v4 = vpop.f32.mrf.mxu1  ;;  %1509 = vadd.xlane.f32.xlu1 %v1508_v3 }
 0x2d1   : > { %v1359_v6 = vadd.f32 %v2614_v44, %v1358_v4 }
 0x2d3   : > { %v1376_v10 = vmax.f32 %v1359_v6, 0.0  ;;  %v1468_v11 = vpop.xlane.xlu2 %1467 }
 0x2d4   : > { %v1514_v14 = vadd.f32 %v1468_v11, %v1400_v26 }
 0x2d5   : > { %v1465_v22 = vmul.f32 %v2620_v19, %v1376_v10 }
 0x2d6   : > { %v1534_v44 = vadd.f32 %v2679_v8, %v1514_v14 }
 0x2d7   : > { %v1511_v27 = vsel %vm1397_vm2, %v1465_v22, 0.0 }
 0x2d8   : > { %1551 = vst.msk [vmem:[%s2687_s29] sm:$0xff] %vm1550_vm12, %v1534_v44  ;;  %1512 = vadd.xlane.f32.xlu2 %v1511_v27 }
 0x2db   : > { %v1471_v16 = vpop.xlane.xlu0 %1470 }
 0x2dc   : > { %v1515_v17 = vadd.f32 %v1471_v16, %v1403_v12 }
 0x2de   : > { %v1535_v21 = vadd.f32 %v2679_v8, %v1515_v17 }
 0x2e0   : > { %1552 = vst.msk [vmem:[%s2687_s29 + $0x8] sm:$0xff] %vm1550_vm12, %v1535_v21 }
 0x2e3   : > { %v1474_v23 = vpop.xlane.xlu1 %1473 }
 0x2e4   : > { %v1516_v24 = vadd.f32 %v1474_v23, %v1406_v48 }
 0x2e6   : > { %v1536_v19 = vadd.f32 %v2679_v8, %v1516_v24 }
 0x2e8   : > { %1553 = vst.msk [vmem:[%s2687_s29 + $0x10] sm:$0xff] %vm1550_vm12, %v1536_v19 }
 0x2eb   : > { %v1477_v25 = vpop.xlane.xlu2 %1476 }
 0x2ec   : > { %v1517_v26 = vadd.f32 %v1477_v25, %v1409_v36 }
 0x2ee   : > { %v1537_v28 = vadd.f32 %v2679_v8, %v1517_v26 }
 0x2f0   : > { %1554 = vst.msk [vmem:[%s2687_s29 + $0x18] sm:$0xff] %vm1550_vm12, %v1537_v28 }
 0x2f3   : > { %v1480_v7 = vpop.xlane.xlu0 %1479 }
 0x2f4   : > { %v1518_v20 = vadd.f32 %v1480_v7, %v1412_v51 }
 0x2f6   : > { %v1538_v29 = vadd.f32 %v2679_v8, %v1518_v20 }
 0x2f8   : > { %1555 = vst.msk [vmem:[%s2687_s29 + $0x20] sm:$0xff] %vm1550_vm12, %v1538_v29 }
 0x2fb   : > { %v1483_v30 = vpop.xlane.xlu1 %1482 }
 0x2fc   : > { %v1519_v1 = vadd.f32 %v1483_v30, %v1415_v18 }
 0x2fe   : > { %v1539_v32 = vadd.f32 %v2679_v8, %v1519_v1 }
 0x300   : > { %1556 = vst.msk [vmem:[%s2687_s29 + $0x28] sm:$0xff] %vm1550_vm12, %v1539_v32 }
 0x303   : > { %v1486_v33 = vpop.xlane.xlu2 %1485 }
 0x304   : > { %v1520_v34 = vadd.f32 %v1486_v33, %v1418_v5 }
 0x306   : > { %v1540_v35 = vadd.f32 %v2679_v8, %v1520_v34 }
 0x308   : > { %1557 = vst.msk [vmem:[%s2687_s29 + $0x30] sm:$0xff] %vm1550_vm12, %v1540_v35 }
 0x30b   : > { %v1489_v37 = vpop.xlane.xlu0 %1488 }
 0x30c   : > { %v1521_v36 = vadd.f32 %v1489_v37, %v1421_v0 }
 0x30e   : > { %v1541_v39 = vadd.f32 %v2679_v8, %v1521_v36 }
 0x310   : > { %1558 = vst.msk [vmem:[%s2687_s29 + $0x38] sm:$0xff] %vm1550_vm12, %v1541_v39 }
 0x313   : > { %v1492_v40 = vpop.xlane.xlu1 %1491 }
 0x314   : > { %v1522_v42 = vadd.f32 %v1492_v40, %v2655_v38 }
 0x316   : > { %v1542_v43 = vadd.f32 %v2679_v8, %v1522_v42 }
 0x318   : > { %1559 = vst.msk [vmem:[%s2687_s29 + $0x40] sm:$0xff] %vm1550_vm12, %v1542_v43 }
 0x31b   : > { %v1495_v45 = vpop.xlane.xlu2 %1494 }
 0x31c   : > { %v1523_v12 = vadd.f32 %v1495_v45, %v2660_v46 }
 0x31e   : > { %v1543_v47 = vadd.f32 %v2679_v8, %v1523_v12 }
 0x320   : > { %1560 = vst.msk [vmem:[%s2687_s29 + $0x48] sm:$0xff] %vm1550_vm12, %v1543_v47 }
 0x323   : > { %v1498_v50 = vpop.xlane.xlu0 %1497 }
 0x324   : > { %v1524_v51 = vadd.f32 %v1498_v50, %v2650_v31 }
 0x326   : > { %v1544_v52 = vadd.f32 %v2679_v8, %v1524_v51 }
 0x328   : > { %1561 = vst.msk [vmem:[%s2687_s29 + $0x50] sm:$0xff] %vm1550_vm12, %v1544_v52 }
 0x32b   : > { %v1501_v38 = vpop.xlane.xlu1 %1500 }
 0x32c   : > { %v1525_v53 = vadd.f32 %v1501_v38, %v2666_v57 }
 0x32e   : > { %v1545_v55 = vadd.f32 %v2679_v8, %v1525_v53 }
 0x330   : > { %1562 = vst.msk [vmem:[%s2687_s29 + $0x58] sm:$0xff] %vm1550_vm12, %v1545_v55 }
 0x333   : > { %v1504_v46 = vpop.xlane.xlu2 %1503 }
 0x334   : > { %v1526_v48 = vadd.f32 %v1504_v46, %v2673_v63 }
 0x336   : > { %v1546_v56 = vadd.f32 %v2679_v8, %v1526_v48 }
 0x338   : > { %1563 = vst.msk [vmem:[%s2687_s29 + $0x60] sm:$0xff] %vm1550_vm12, %v1546_v56 }
 0x33b   : > { %v1507_v31 = vpop.xlane.xlu0 %1506 }
 0x33c   : > { %v1527_v41 = vadd.f32 %v1507_v31, %v2669_v59 }
 0x33e   : > { %v1547_v58 = vadd.f32 %v2679_v8, %v1527_v41 }
 0x340   : > { %1564 = vst.msk [vmem:[%s2687_s29 + $0x68] sm:$0xff] %vm1550_vm12, %v1547_v58 }
 0x343   : > { %v1510_v57 = vpop.xlane.xlu1 %1509 }
 0x344   : > { %v1528_v60 = vadd.f32 %v1510_v57, %v2681_v9 }
 0x346   : > { %v1548_v13 = vadd.f32 %v2679_v8, %v1528_v60 }
 0x348   : > { %1565 = vst.msk [vmem:[%s2687_s29 + $0x70] sm:$0xff] %vm1550_vm12, %v1548_v13 }
 0x34b   : > { %v1513_v61 = vpop.xlane.xlu2 %1512 }
 0x34c   : > { %v1529_v62 = vadd.f32 %v1513_v61, %v1445_v15 }
 0x34e   : > { %v1549_v63 = vadd.f32 %v2679_v8, %v1529_v62 }
 0x350   : > { %1566 = vst.msk [vmem:[%s2687_s29 + $0x78] sm:$0xff] %vm1550_vm12, %v1549_v63 }
 0x351 PF: > { %s26_s15 = sadd.s32 1, %s1833_s15  }
 0x352   : > { %p23_p4 = scmp.ge.s32.totalorder %s26_s15, 4  }
 0x354   :  { %25 = sbr.rel (!%p23_p4) target bundleno = 3 (0x3), region = 109 }

</bundles_post_ra>
